<compile_context>
chip_gen: v7x
topology: tpu7x:2x2x1
jax: 0.10.0
libtpu: 0.0.40
codegen_flags: <defaults>
</compile_context>

<pallas_src>
import functools

import jax
import jax.numpy as jnp
from jax.experimental import pallas as pl
from jax.experimental.pallas import tpu as pltpu

HIDDEN = 1024
W3_PAD = 128   # lane-aligned padding for the N=1 output projection


def _round_up(n, m):
    return ((n + m - 1) // m) * m


def _mlp_kernel(x_ref, w1_ref, b1_ref, w2_ref, b2_ref, w3_ref, b3_ref, o_ref,
                *, l1_on_vpu):
    x = x_ref[...]                      # (TB, K)  f32
    b1 = b1_ref[...]                    # (1, H)   f32

    # ---- layer 1 (+ ReLU; dropout p=0 -> identity) --------------------------------
    if l1_on_vpu:
        # K is tiny: a K-step broadcast multiply on the VPU instead of a degenerate
        # K<8 MXU contraction; it hides under the W2 matmul below.
        h1 = b1
        for j in range(x_ref.shape[1]):                     # static, tiny trip count
            h1 = h1 + x[:, j:j + 1].astype(jnp.float32) * w1_ref[j:j + 1, :].astype(jnp.float32)
    else:
        h1 = jnp.dot(x.astype(w1_ref.dtype), w1_ref[...],
                     preferred_element_type=jnp.float32) + b1
    h1 = jnp.maximum(h1, 0.0)

    # ---- layer 2 (+ ReLU): the hot 1024x1024 matmul, bf16 operands / f32 accum -----
    h2 = jnp.dot(h1.astype(w2_ref.dtype), w2_ref[...],
                 preferred_element_type=jnp.float32) + b2_ref[...]
    h2 = jnp.maximum(h2, 0.0)

    # ---- layer 3: 1024 -> 1 projection on the MXU via the lane-padded W3 slab ------
    # (TB, H) @ (H, 128) -> (TB, 128); real output lives in column 0.
    o128 = jnp.dot(h2.astype(w3_ref.dtype), w3_ref[...],
                   preferred_element_type=jnp.float32)
    o_ref[...] = (o128[:, 0:1] + b3_ref[0, 0]).astype(o_ref.dtype)   # b3 scalar in SMEM


def bp_simple_regressor(x, params, *, batch_tile=512, use_bf16=True):
    """Forward pass. x: (B, input_dim) f32 -> (B, 1) f32."""
    w1, b1, w2, b2, w3, b3 = params
    B, input_dim = x.shape
    assert w1.shape == (input_dim, HIDDEN)

    # ---- batch tiling: big MXU-aligned tile; clamp + zero-pad for small/ragged B ----
    tb = min(batch_tile, _round_up(B, 8))
    tb = _round_up(tb, 8)
    bp = _round_up(B, tb)
    if bp == tb and tb >= 256:
        # Keep >= 2 grid steps so both v7x TensorCores get work on the parallel axis.
        tb = _round_up(tb // 2, 8)
        bp = _round_up(B, tb)
    grid = (bp // tb,)
    if bp != B:
        x = jnp.pad(x, ((0, bp - B), (0, 0)))

    # ---- matmul operand dtype: bf16 on the MXU, accumulation stays f32 in-kernel ----
    mxu_layer1 = input_dim >= 8
    mm_dtype = jnp.bfloat16 if use_bf16 else jnp.float32
    w2 = w2.astype(mm_dtype)
    if mxu_layer1:
        w1 = w1.astype(mm_dtype)

    # Lane-pad the (1, H) output-projection row into a fully aligned (H, 128) column slab.
    w3p = jnp.zeros((HIDDEN, W3_PAD), mm_dtype).at[:, 0].set(w3[0].astype(mm_dtype))

    full = lambda i: (0, 0)   # weights/biases: constant block index, fetched once
    kernel = functools.partial(_mlp_kernel, l1_on_vpu=not mxu_layer1)

    out = pl.pallas_call(
        kernel,
        out_shape=jax.ShapeDtypeStruct((bp, 1), jnp.float32),
        grid_spec=pltpu.PrefetchScalarGridSpec(
            num_scalar_prefetch=0,
            grid=grid,
            in_specs=[
                pl.BlockSpec((tb, input_dim), lambda i: (i, 0)),    # x tile
                pl.BlockSpec((input_dim, HIDDEN), full),            # W1 [in, out]
                pl.BlockSpec((1, HIDDEN), full),                    # b1
                pl.BlockSpec((HIDDEN, HIDDEN), full),               # W2 [in, out]
                pl.BlockSpec((1, HIDDEN), full),                    # b2
                pl.BlockSpec((HIDDEN, W3_PAD), full),               # W3 padded column slab
                pl.BlockSpec(memory_space=pltpu.MemorySpace.SMEM),  # b3 scalar
            ],
            out_specs=pl.BlockSpec((tb, 1), lambda i: (i, 0)),
        ),
        compiler_params=pltpu.CompilerParams(
            dimension_semantics=("parallel",),
            vmem_limit_bytes=32 * 1024 * 1024,
        ),
    )(x, w1, b1, w2, b2, w3p, b3)

    return out[:B] if bp != B else out


def init_params(key, input_dim=1):
    """Deterministic synthetic init (PyTorch Linear-shaped params; W1/W2 stored [in, out])."""
    k1, k2, k3, k4, k5, k6 = jax.random.split(key, 6)

    def uniform_like_torch(k, shape, fan_in):
        bound = 1.0 / jnp.sqrt(jnp.float32(fan_in))
        return jax.random.uniform(k, shape, jnp.float32, -bound, bound)

    w1 = uniform_like_torch(k1, (input_dim, HIDDEN), input_dim)   # linear_1
    b1 = uniform_like_torch(k2, (1, HIDDEN), input_dim)
    w2 = uniform_like_torch(k3, (HIDDEN, HIDDEN), HIDDEN)         # linear_2
    b2 = uniform_like_torch(k4, (1, HIDDEN), HIDDEN)
    w3 = uniform_like_torch(k5, (1, HIDDEN), HIDDEN)              # linear_3 (native row)
    b3 = uniform_like_torch(k6, (1, 1), HIDDEN)
    return (w1, b1, w2, b2, w3, b3)


def reference_forward(x, params, *, use_bf16=True):
    """Pure-JAX reference mirroring the kernel's precision choices."""
    w1, b1, w2, b2, w3, b3 = params
    input_dim = x.shape[1]
    mm = jnp.bfloat16 if use_bf16 else jnp.float32
    if input_dim >= 8:
        h1 = jnp.dot(x.astype(mm), w1.astype(mm), preferred_element_type=jnp.float32) + b1
    else:
        h1 = x @ w1 + b1
    h1 = jnp.maximum(h1, 0.0)
    h2 = jnp.dot(h1.astype(mm), w2.astype(mm), preferred_element_type=jnp.float32) + b2
    h2 = jnp.maximum(h2, 0.0)
    o = jnp.dot(h2.astype(mm), w3.astype(mm).T, preferred_element_type=jnp.float32) + b3
    return o


def reference_forward_f32(x, params):
    """Straight f32 reference of the PyTorch module semantics."""
    w1, b1, w2, b2, w3, b3 = params
    h1 = jnp.maximum(x @ w1 + b1, 0.0)
    h2 = jnp.maximum(h1 @ w2 + b2, 0.0)
    return h2 @ w3.T + b3


if __name__ == "__main__":
    key = jax.random.PRNGKey(0)
    kx, kp = jax.random.split(key)

    B, input_dim = 8, 1   # scalar-input regressor: x is (batch, 1); hidden width 1024 is fixed by the module
    x = jax.random.normal(kx, (B, input_dim), jnp.float32)
    params = init_params(kp, input_dim=input_dim)

    out = bp_simple_regressor(x, params)          # batch_tile=512 (clamped to B), bf16 matmul operands
    out = jax.block_until_ready(out)

    assert out.shape == (B, 1)
    ref = reference_forward(x, params, use_bf16=True)
    assert jnp.allclose(out, ref, atol=5e-3, rtol=5e-3), float(jnp.max(jnp.abs(out - ref)))
    ref32 = reference_forward_f32(x, params)
    assert jnp.allclose(out, ref32, atol=5e-2, rtol=5e-2), float(jnp.max(jnp.abs(out - ref32)))
    print("KERNEL_OK")
</pallas_src>

<mosaic_0001>
module attributes {stable_mosaic.version = 11 : i64} {
  func.func @_mlp_kernel(%arg0: i32, %arg1: memref<8x1xf32, #tpu.memory_space<vmem>>, %arg2: memref<1x1024xf32, #tpu.memory_space<vmem>>, %arg3: memref<1x1024xf32, #tpu.memory_space<vmem>>, %arg4: memref<1024x1024xbf16, #tpu.memory_space<vmem>>, %arg5: memref<1x1024xf32, #tpu.memory_space<vmem>>, %arg6: memref<1024x128xbf16, #tpu.memory_space<vmem>>, %arg7: memref<1x1xf32, #tpu.memory_space<smem>>, %arg8: memref<8x1xf32, #tpu.memory_space<vmem>>) attributes {dimension_semantics = [#tpu.dimension_semantics<parallel>], iteration_bounds = array<i64: 1>, scalar_prefetch = 0 : i64, scratch_operands = 0 : i64, tpu.core_type = #tpu.core_type<tc>, window_params = [{transform_indices = @transform_0, window_bounds = array<i64: 8, 1>}, {pipeline_mode = #tpu.pipeline_mode<synchronous>, transform_indices = @transform_1, window_bounds = array<i64: 1, 1024>}, {pipeline_mode = #tpu.pipeline_mode<synchronous>, transform_indices = @transform_2, window_bounds = array<i64: 1, 1024>}, {pipeline_mode = #tpu.pipeline_mode<synchronous>, transform_indices = @transform_3, window_bounds = array<i64: 1024, 1024>}, {pipeline_mode = #tpu.pipeline_mode<synchronous>, transform_indices = @transform_4, window_bounds = array<i64: 1, 1024>}, {pipeline_mode = #tpu.pipeline_mode<synchronous>, transform_indices = @transform_5, window_bounds = array<i64: 1024, 128>}, {transform_indices = @transform_6, window_bounds = array<i64: 1, 1>}, {transform_indices = @transform_7, window_bounds = array<i64: 8, 1>}]} {
    %c0 = arith.constant 0 : index
    %c0_0 = arith.constant 0 : index
    %0 = vector.load %arg1[%c0, %c0_0] : memref<8x1xf32, #tpu.memory_space<vmem>>, vector<8x1xf32>
    %c0_1 = arith.constant 0 : index
    %c0_2 = arith.constant 0 : index
    %1 = vector.load %arg3[%c0_1, %c0_2] : memref<1x1024xf32, #tpu.memory_space<vmem>>, vector<1x1024xf32>
    %c0_3 = arith.constant 0 : index
    %c0_4 = arith.constant 0 : index
    %2 = vector.load %arg2[%c0_3, %c0_4] : memref<1x1024xf32, #tpu.memory_space<vmem>>, vector<1x1024xf32>
    %3 = vector.broadcast %0 : vector<8x1xf32> to vector<8x1024xf32>
    %4 = vector.broadcast %2 : vector<1x1024xf32> to vector<8x1024xf32>
    %5 = arith.mulf %3, %4 : vector<8x1024xf32>
    %6 = vector.broadcast %1 : vector<1x1024xf32> to vector<8x1024xf32>
    %7 = arith.addf %6, %5 : vector<8x1024xf32>
    %cst = arith.constant 0.000000e+00 : f32
    %8 = vector.broadcast %cst : f32 to vector<8x1024xf32>
    %9 = arith.maximumf %7, %8 : vector<8x1024xf32>
    %10 = arith.truncf %9 : vector<8x1024xf32> to vector<8x1024xbf16>
    %c0_5 = arith.constant 0 : index
    %c0_6 = arith.constant 0 : index
    %11 = vector.load %arg4[%c0_5, %c0_6] : memref<1024x1024xbf16, #tpu.memory_space<vmem>>, vector<1024x1024xbf16>
    %cst_7 = arith.constant dense<0.000000e+00> : vector<8x1024xf32>
    %12 = tpu.matmul %10, %11, %cst_7 {dimension_numbers = #tpu.dot_dimension_numbers<[1], [0], [0], [1], [0, 0, 1, 1], [], []>} : vector<8x1024xbf16>, vector<1024x1024xbf16>, vector<8x1024xf32> -> vector<8x1024xf32>
    %c0_8 = arith.constant 0 : index
    %c0_9 = arith.constant 0 : index
    %13 = vector.load %arg5[%c0_8, %c0_9] : memref<1x1024xf32, #tpu.memory_space<vmem>>, vector<1x1024xf32>
    %14 = vector.broadcast %13 : vector<1x1024xf32> to vector<8x1024xf32>
    %15 = arith.addf %12, %14 : vector<8x1024xf32>
    %cst_10 = arith.constant 0.000000e+00 : f32
    %16 = vector.broadcast %cst_10 : f32 to vector<8x1024xf32>
    %17 = arith.maximumf %15, %16 : vector<8x1024xf32>
    %18 = arith.truncf %17 : vector<8x1024xf32> to vector<8x1024xbf16>
    %c0_11 = arith.constant 0 : index
    %c0_12 = arith.constant 0 : index
    %19 = vector.load %arg6[%c0_11, %c0_12] : memref<1024x128xbf16, #tpu.memory_space<vmem>>, vector<1024x128xbf16>
    %cst_13 = arith.constant dense<0.000000e+00> : vector<8x128xf32>
    %20 = tpu.matmul %18, %19, %cst_13 {dimension_numbers = #tpu.dot_dimension_numbers<[1], [0], [0], [1], [0, 0, 1, 1], [], []>} : vector<8x1024xbf16>, vector<1024x128xbf16>, vector<8x128xf32> -> vector<8x128xf32>
    %21 = vector.extract_strided_slice %20 {offsets = [0, 0], sizes = [8, 1], strides = [1, 1]} : vector<8x128xf32> to vector<8x1xf32>
    %c0_14 = arith.constant 0 : index
    %c0_15 = arith.constant 0 : index
    %22 = memref.load %arg7[%c0_14, %c0_15] : memref<1x1xf32, #tpu.memory_space<smem>>
    %23 = vector.broadcast %22 : f32 to vector<8x1xf32>
    %24 = arith.addf %21, %23 : vector<8x1xf32>
    %c0_16 = arith.constant 0 : index
    %c0_17 = arith.constant 0 : index
    %25 = vector.load %arg8[%c0_16, %c0_17] : memref<8x1xf32, #tpu.memory_space<vmem>>, vector<8x1xf32>
    tpu.vector_store %arg8[%c0_16, %c0_17], %24 {strides = array<i32>} : memref<8x1xf32, #tpu.memory_space<vmem>>, vector<8x1xf32>,
    return
  }
  func.func @transform_0(%arg0: i32) -> (i32, i32) {
    %c0_i32 = arith.constant 0 : i32
    %c0_i32_0 = arith.constant 0 : i32
    return %arg0, %c0_i32 : i32, i32
  }
  func.func @transform_1(%arg0: i32) -> (i32, i32) {
    %c0_i32 = arith.constant 0 : i32
    %c0_i32_0 = arith.constant 0 : i32
    %c0_i32_1 = arith.constant 0 : i32
    return %c0_i32, %c0_i32_0 : i32, i32
  }
  func.func @transform_2(%arg0: i32) -> (i32, i32) {
    %c0_i32 = arith.constant 0 : i32
    %c0_i32_0 = arith.constant 0 : i32
    %c0_i32_1 = arith.constant 0 : i32
    return %c0_i32, %c0_i32_0 : i32, i32
  }
  func.func @transform_3(%arg0: i32) -> (i32, i32) {
    %c0_i32 = arith.constant 0 : i32
    %c0_i32_0 = arith.constant 0 : i32
    %c0_i32_1 = arith.constant 0 : i32
    return %c0_i32, %c0_i32_0 : i32, i32
  }
  func.func @transform_4(%arg0: i32) -> (i32, i32) {
    %c0_i32 = arith.constant 0 : i32
    %c0_i32_0 = arith.constant 0 : i32
    %c0_i32_1 = arith.constant 0 : i32
    return %c0_i32, %c0_i32_0 : i32, i32
  }
  func.func @transform_5(%arg0: i32) -> (i32, i32) {
    %c0_i32 = arith.constant 0 : i32
    %c0_i32_0 = arith.constant 0 : i32
    %c0_i32_1 = arith.constant 0 : i32
    return %c0_i32, %c0_i32_0 : i32, i32
  }
  func.func @transform_6(%arg0: i32) -> (i32, i32) {
    %c0_i32 = arith.constant 0 : i32
    %c0_i32_0 = arith.constant 0 : i32
    %c0_i32_1 = arith.constant 0 : i32
    return %c0_i32, %c0_i32_0 : i32, i32
  }
  func.func @transform_7(%arg0: i32) -> (i32, i32) {
    %c0_i32 = arith.constant 0 : i32
    %c0_i32_0 = arith.constant 0 : i32
    return %arg0, %c0_i32 : i32, i32
  }
}

</mosaic_0001>

<bundles_post_ra>
// kernel: tpu_custom_call.1
= control target key start
LH: loop header
LB: loop body
LE: loop exit
PB: predicated region body
PF: predicated region fallthrough
CT: control target
= control target key end

     0   :  { %13 = vsyncpa [#allocation4], 0  ;;  %s5866_s0 = inlined_call_operand.vmem [shape: f32[8,1], index: 0, kind: input, shape index: {}]   ;;  %s5867_s1 = inlined_call_operand.hbm [shape: f32[1,1024], index: 1, kind: input, shape index: {}]   ;;  %s5868_s2 = inlined_call_operand.hbm [shape: f32[1,1024], index: 2, kind: input, shape index: {}]   ;;  %s5869_s3 = inlined_call_operand.hbm [shape: bf16[1024,1024], index: 3, kind: input, shape index: {}]   ;;  %s5870_s4 = inlined_call_operand.hbm [shape: f32[1,1024], index: 4, kind: input, shape index: {}]   ;;  %s5871_s5 = inlined_call_operand.hbm [shape: bf16[1024,128], index: 5, kind: input, shape index: {}]   ;;  %s5872_s6 = inlined_call_operand.<no memory space> [shape: f32[1,1], index: 6, kind: input, shape index: {}]   ;;  %s5873_s7 = inlined_call_operand.vmem [shape: f32[8,1], index: 7, kind: output, shape index: {}]  }
   0x1   :  { %14 = vsyncpa [#allocation6], 0 }
   0x2   :  { %15 = vsyncpa [#allocation9], 0  ;;  %s5593_s24 = smov [#allocation5]   ;;  %s5594_s26 = smov [#allocation8]  }
   0x3   :  { %s34_s25 = sshll.u32 %s5593_s24, 4  ;;  %s56_s27 = sshll.u32 %s5594_s26, 4  ;;  %s35_s25 = int_to_ptr.vmem [resolvable:$true] %s34_s25  ;;  %s57_s27 = int_to_ptr.vmem [resolvable:$true] %s56_s27 }
   0x4   :  { %s5477_s30 = scalar_lea.hbm %s5868_s2, 128 }
   0x5   :  { %p5478_p0 = scmp.ne.s32.totalorder %s5868_s2, %s5477_s30  ;;  %p5481_p1 = scmp.lt.u32.totalorder %s5477_s30, %s5868_s2 }
   0x7   :  { %p5483_p2 = pnand %p5481_p1, %p5478_p0 }
   0x9   :  { %5486 = shalt.err (!%p5483_p2)
}
   0xa   :  { %s5487_s12 = scalar_lea.vmem %s35_s25, 128  ;;  %p5492_p4 = scmp.lt.s32.totalorder %s35_s25, %s35_s25 }
   0xb   :  { %p5488_p3 = scmp.ne.s32.totalorder %s35_s25, %s5487_s12  ;;  %p5493_p5 = scmp.lt.s32.totalorder %s5487_s12, %s5487_s12 }
   0xd   :  { %p5494_p6 = por %p5493_p5, %p5492_p4 }
   0xf   :  { %p5495_p7 = pnand %p5494_p6, %p5488_p3 }
  0x11   :  { %5498 = shalt.err (!%p5495_p7)
}
  0x12   :  { %37 = dma.hbm_to_vmem [thread:$0]  %s5868_s2, 128, %s35_s25, [#allocation6]  }
  0x13   :  { %s5499_s17 = scalar_lea.hbm %s5870_s4, 128 }
  0x14   :  { %p5500_p8 = scmp.ne.s32.totalorder %s5870_s4, %s5499_s17  ;;  %p5503_p9 = scmp.lt.u32.totalorder %s5499_s17, %s5870_s4 }
  0x16   :  { %p5505_p10 = pnand %p5503_p9, %p5500_p8 }
  0x18   :  { %5508 = shalt.err (!%p5505_p10)
}
  0x19   :  { %s5509_s22 = scalar_lea.vmem %s57_s27, 128  ;;  %p5514_p12 = scmp.lt.s32.totalorder %s57_s27, %s57_s27 }
  0x1a   :  { %p5510_p11 = scmp.ne.s32.totalorder %s57_s27, %s5509_s22  ;;  %p5515_p13 = scmp.lt.s32.totalorder %s5509_s22, %s5509_s22 }
  0x1c   :  { %p5516_p0 = por %p5515_p13, %p5514_p12 }
  0x1e   :  { %p5517_p1 = pnand %p5516_p0, %p5510_p11 }
  0x20   :  { %5520 = shalt.err (!%p5517_p1)
}
  0x21   :  { %59 = dma.hbm_to_vmem [thread:$0]  %s5870_s4, 128, %s57_s27, [#allocation9]  }
  0x22   :  { %s5595_s24 = smov [#allocation3]   ;;  %s5596_s26 = smov [#allocation7]  }
  0x23   :  { %s24_s25 = sshll.u32 %s5595_s24, 4  ;;  %s43_s28 = sshll.u32 %s5596_s26, 4  ;;  %s25_s25 = int_to_ptr.vmem [resolvable:$true] %s24_s25  ;;  %s5667_s28 = int_to_ptr.vmem [resolvable:$true] %s43_s28 }
  0x24   :  { %s5521_s8 = scalar_lea.hbm %s5867_s1, 128 }
  0x25   :  { %p5522_p2 = scmp.ne.s32.totalorder %s5867_s1, %s5521_s8  ;;  %p5525_p3 = scmp.lt.u32.totalorder %s5521_s8, %s5867_s1 }
  0x27   :  { %p5527_p4 = pnand %p5525_p3, %p5522_p2 }
  0x29   :  { %5530 = shalt.err (!%p5527_p4)
}
  0x2a   :  { %s5531_s4 = scalar_lea.vmem %s25_s25, 128  ;;  %p5536_p6 = scmp.lt.s32.totalorder %s25_s25, %s25_s25 }
  0x2b   :  { %p5532_p5 = scmp.ne.s32.totalorder %s25_s25, %s5531_s4  ;;  %p5537_p7 = scmp.lt.s32.totalorder %s5531_s4, %s5531_s4 }
  0x2d   :  { %p5538_p8 = por %p5537_p7, %p5536_p6 }
  0x2f   :  { %p5539_p9 = pnand %p5538_p8, %p5532_p5 }
  0x31   :  { %5542 = shalt.err (!%p5539_p9)
}
  0x32   :  { %27 = dma.hbm_to_vmem [thread:$0]  %s5867_s1, 128, %s25_s25, [#allocation4]  }
  0x33   :  { %s5543_s16 = scalar_lea.hbm %s5869_s3, 65536 }
  0x34   :  { %p5544_p10 = scmp.ne.s32.totalorder %s5869_s3, %s5543_s16  ;;  %p5547_p11 = scmp.lt.u32.totalorder %s5543_s16, %s5869_s3 }
  0x36   :  { %p5549_p12 = pnand %p5547_p11, %p5544_p10 }
  0x38   :  { %5552 = shalt.err (!%p5549_p12)
}
  0x39   :  { %s5553_s21 = scalar_lea.vmem %s5667_s28, 65536  ;;  %p5558_p0 = scmp.lt.s32.totalorder %s5667_s28, %s5667_s28 }
  0x3a   :  { %p5554_p13 = scmp.ne.s32.totalorder %s5667_s28, %s5553_s21  ;;  %p5559_p1 = scmp.lt.s32.totalorder %s5553_s21, %s5553_s21 }
  0x3c   :  { %p5560_p2 = por %p5559_p1, %p5558_p0 }
  0x3e   :  { %p5561_p3 = pnand %p5560_p2, %p5554_p13 }
  0x40   :  { %5564 = shalt.err (!%p5561_p3)
}
  0x41   :  { %s5597_s1 = smov 512   ;;  %s5598_s22 = smov 32  }
  0x42   :  { %49 = dma.hbm_to_vmem [thread:$0]  %s5869_s3, 65536, %s5667_s28, [#allocation6], %s5597_s1, %s5597_s1, %s5598_s22  }
  0x43   :  { %s5599_s24 = smov [#allocation10]   ;;  %s5565_s30 = scalar_lea.hbm %s5871_s5, 8192 }
  0x44   :  { %s65_s25 = sshll.u32 %s5599_s24, 4  ;;  %p5566_p4 = scmp.ne.s32.totalorder %s5871_s5, %s5565_s30  ;;  %s66_s25 = int_to_ptr.vmem [resolvable:$true] %s65_s25 }
  0x45   :  { %p5569_p5 = scmp.lt.u32.totalorder %s5565_s30, %s5871_s5 }
  0x47   :  { %p5571_p6 = pnand %p5569_p5, %p5566_p4 }
  0x49   :  { %5574 = shalt.err (!%p5571_p6)
}
  0x4a   :  { %s5575_s12 = scalar_lea.vmem %s66_s25, 8192  ;;  %p5580_p8 = scmp.lt.s32.totalorder %s66_s25, %s66_s25 }
  0x4b   :  { %p5576_p7 = scmp.ne.s32.totalorder %s66_s25, %s5575_s12  ;;  %p5581_p9 = scmp.lt.s32.totalorder %s5575_s12, %s5575_s12 }
  0x4d   :  { %p5582_p10 = por %p5581_p9, %p5580_p8 }
  0x4f   :  { %p5583_p11 = pnand %p5582_p10, %p5576_p7 }
  0x51   :  { %5586 = shalt.err (!%p5583_p11)
}
  0x52   :  { %s5600_s3 = smov 64   ;;  %s5601_s28 = smov 4  }
  0x53   :  { %71 = dma.hbm_to_vmem [thread:$0]  %s5871_s5, 8192, %s66_s25, [#allocation9], %s5600_s3, %s5600_s3, %s5601_s28  }
  0x54   :  { %5587 = dma.done.wait [#allocation4], 128  }
  0x55   :  { %5588 = vsyncadd [#allocation4], 4294967168 }
  0x56   :  { %5589 = dma.done.wait [#allocation6], 65664  }
  0x57   :  { %5590 = vsyncadd [#allocation6], 4294901632 }
  0x58   :  { %5591 = dma.done.wait [#allocation9], 8320  }
  0x59   :  { %5592 = vsyncadd [#allocation9], 4294958976  ;;  %v5602_v0 = vmov 0   ;;  %v90_v1 = vld [vmem:[%s5866_s0] sm:$0xff]  ;;  %v212_v2 = vld [vmem:[#allocation7] sm:$0xff]  ;;  %vm4673_vm0 = vcmask 7168  }
  0x5a   :  { %5412 = vset.pattern.permute.xlu0 %v5602_v0  ;;  %v216_v3 = vld [vmem:[#allocation7 + $0x20] sm:$0xff]  ;;  %v213_v5 = vld [vmem:[#allocation7 + $0x8] sm:$0xff] }
  0x5b   :  { %95 = vperm.xlu0 %5412, %v90_v1   ;;  %v4683_v4 = vcombine.high %v212_v2, %v216_v3  ;;  %v217_v6 = vld [vmem:[#allocation7 + $0x28] sm:$0xff]  ;;  %v4682_v7 = vcombine.low %v212_v2, %v216_v3  ;;  %v220_v8 = vld [vmem:[#allocation7 + $0x40] sm:$0xff] }
  0x5c   :  { %v4685_v9 = vcombine.high %v213_v5, %v217_v6  ;;  %v4684_v10 = vcombine.low %v213_v5, %v217_v6  ;;  %v224_v11 = vld [vmem:[#allocation7 + $0x60] sm:$0xff]  ;;  %v221_v12 = vld [vmem:[#allocation7 + $0x48] sm:$0xff] }
  0x5d   :  { %v225_v13 = vld [vmem:[#allocation7 + $0x68] sm:$0xff]  ;;  %3326 = vmatprep.subr.bf16.mxu0 %v4683_v4  ;;  %v4691_v14 = vcombine.high %v220_v8, %v224_v11  ;;  %v228_v16 = vld [vmem:[#allocation7 + $0x80] sm:$0xff]  ;;  %v4690_v19 = vcombine.low %v220_v8, %v224_v11 }
  0x5e   :  { %v4693_v15 = vcombine.high %v221_v12, %v225_v13  ;;  %v232_v17 = vld [vmem:[#allocation7 + $0xa0] sm:$0xff]  ;;  %v229_v18 = vld [vmem:[#allocation7 + $0x88] sm:$0xff]  ;;  %3490 = vmatprep.subr.bf16.mxu1 %v4685_v9  ;;  %3327 = vmatpush1.bf16.msra.mxu0 %v4682_v7  ;;  %v4692_v21 = vcombine.low %v221_v12, %v225_v13 }
  0x5f   :  { %v233_v20 = vld [vmem:[#allocation7 + $0xa8] sm:$0xff]  ;;  %3491 = vmatpush1.bf16.msra.mxu1 %v4684_v10  ;;  %3328 = vmatprep.subr.bf16.mxu0 %v4691_v14  ;;  %v4699_v22 = vcombine.high %v228_v16, %v232_v17  ;;  %v236_v24 = vld [vmem:[#allocation7 + $0xc0] sm:$0xff]  ;;  %v4698_v28 = vcombine.low %v228_v16, %v232_v17 }
  0x60   :  { %3492 = vmatprep.subr.bf16.mxu1 %v4693_v15  ;;  %v4701_v23 = vcombine.high %v229_v18, %v233_v20  ;;  %v240_v25 = vld [vmem:[#allocation7 + $0xe0] sm:$0xff]  ;;  %v237_v26 = vld [vmem:[#allocation7 + $0xc8] sm:$0xff]  ;;  %v4700_v29 = vcombine.low %v229_v18, %v233_v20 }
  0x61   :  { %v241_v27 = vld [vmem:[#allocation7 + $0xe8] sm:$0xff]  ;;  %v4707_v30 = vcombine.high %v236_v24, %v240_v25  ;;  %v244_v32 = vld [vmem:[#allocation7 + $0x100] sm:$0xff]  ;;  %v4706_v36 = vcombine.low %v236_v24, %v240_v25 }
  0x62   :  { %3329 = vmatpush1.bf16.msra.mxu0 %v4690_v19  ;;  %v4709_v31 = vcombine.high %v237_v26, %v241_v27  ;;  %v248_v33 = vld [vmem:[#allocation7 + $0x120] sm:$0xff]  ;;  %v245_v34 = vld [vmem:[#allocation7 + $0x108] sm:$0xff]  ;;  %v4708_v37 = vcombine.low %v237_v26, %v241_v27 }
  0x63   :  { %3493 = vmatpush1.bf16.msra.mxu1 %v4692_v21  ;;  %3330 = vmatprep.subr.bf16.mxu0 %v4699_v22  ;;  %v249_v35 = vld [vmem:[#allocation7 + $0x128] sm:$0xff]  ;;  %v4715_v38 = vcombine.high %v244_v32, %v248_v33  ;;  %v252_v40 = vld [vmem:[#allocation7 + $0x140] sm:$0xff]  ;;  %v4714_v44 = vcombine.low %v244_v32, %v248_v33 }
  0x64   :  { %3494 = vmatprep.subr.bf16.mxu1 %v4701_v23  ;;  %v4717_v39 = vcombine.high %v245_v34, %v249_v35  ;;  %v256_v41 = vld [vmem:[#allocation7 + $0x160] sm:$0xff]  ;;  %v253_v42 = vld [vmem:[#allocation7 + $0x148] sm:$0xff]  ;;  %v4716_v45 = vcombine.low %v245_v34, %v249_v35 }
  0x65   :  { %v257_v43 = vld [vmem:[#allocation7 + $0x168] sm:$0xff]  ;;  %v4723_v46 = vcombine.high %v252_v40, %v256_v41  ;;  %v260_v48 = vld [vmem:[#allocation7 + $0x180] sm:$0xff]  ;;  %v4722_v52 = vcombine.low %v252_v40, %v256_v41 }
  0x66   :  { %3331 = vmatpush1.bf16.msra.mxu0 %v4698_v28  ;;  %v4725_v47 = vcombine.high %v253_v42, %v257_v43  ;;  %v264_v49 = vld [vmem:[#allocation7 + $0x1a0] sm:$0xff]  ;;  %v261_v50 = vld [vmem:[#allocation7 + $0x188] sm:$0xff]  ;;  %v4724_v53 = vcombine.low %v253_v42, %v257_v43 }
  0x67   :  { %3495 = vmatpush1.bf16.msra.mxu1 %v4700_v29  ;;  %3332 = vmatprep.subr.bf16.mxu0 %v4707_v30  ;;  %v265_v51 = vld [vmem:[#allocation7 + $0x1a8] sm:$0xff]  ;;  %v4731_v54 = vcombine.high %v260_v48, %v264_v49  ;;  %v268_v55 = vld [vmem:[#allocation7 + $0x1c0] sm:$0xff]  ;;  %v4730_v1 = vcombine.low %v260_v48, %v264_v49 }
  0x68   :  { %3496 = vmatprep.subr.bf16.mxu1 %v4709_v31  ;;  %v272_v56 = vld [vmem:[#allocation7 + $0x1e0] sm:$0xff]  ;;  %v4733_v57 = vcombine.high %v261_v50, %v265_v51  ;;  %v269_v58 = vld [vmem:[#allocation7 + $0x1c8] sm:$0xff]  ;;  %v4732_v3 = vcombine.low %v261_v50, %v265_v51 }
  0x69   :  { %v5713_v59 = vld [vmem:[#allocation7 + $0x400] sm:$0xff]  ;;  %v273_v61 = vld [vmem:[#allocation7 + $0x1e8] sm:$0xff]  ;;  %v4739_v4 = vcombine.high %v268_v55, %v272_v56  ;;  %v4738_v10 = vcombine.low %v268_v55, %v272_v56 }
  0x6a   :  { %3333 = vmatpush1.bf16.msra.mxu0 %v4706_v36  ;;  %v5715_v60 = vld [vmem:[#allocation7 + $0x420] sm:$0xff]  ;;  %v5719_v63 = vld [vmem:[#allocation7 + $0x408] sm:$0xff]  ;;  %v4741_v5 = vcombine.high %v269_v58, %v273_v61  ;;  %v4740_v11 = vcombine.low %v269_v58, %v273_v61 }
  0x6b   :  { %3497 = vmatpush1.bf16.msra.mxu1 %v4708_v37  ;;  %3334 = vmatprep.subr.bf16.mxu0 %v4715_v38  ;;  %v4810_v62 = vcombine.low %v5713_v59, %v5715_v60  ;;  %v5721_v0 = vld [vmem:[#allocation7 + $0x428] sm:$0xff]  ;;  %v276_v6 = vld [vmem:[#allocation7 + $0x200] sm:$0xff] }
  0x6c   :  { %3498 = vmatprep.subr.bf16.mxu1 %v4717_v39  ;;  %v4812_v2 = vcombine.low %v5719_v63, %v5721_v0  ;;  %v280_v7 = vld [vmem:[#allocation7 + $0x220] sm:$0xff]  ;;  %v277_v8 = vld [vmem:[#allocation7 + $0x208] sm:$0xff] }
  0x6d   :  { %v281_v9 = vld [vmem:[#allocation7 + $0x228] sm:$0xff]  ;;  %v4747_v12 = vcombine.high %v276_v6, %v280_v7  ;;  %v284_v13 = vld [vmem:[#allocation7 + $0x240] sm:$0xff]  ;;  %v4746_v18 = vcombine.low %v276_v6, %v280_v7 }
  0x6e   :  { %3335 = vmatpush1.bf16.msra.mxu0 %v4714_v44  ;;  %v4749_v14 = vcombine.high %v277_v8, %v281_v9  ;;  %v288_v15 = vld [vmem:[#allocation7 + $0x260] sm:$0xff]  ;;  %v285_v16 = vld [vmem:[#allocation7 + $0x248] sm:$0xff]  ;;  %v4748_v21 = vcombine.low %v277_v8, %v281_v9 }
  0x6f   :  { %3499 = vmatpush1.bf16.msra.mxu1 %v4716_v45  ;;  %3336 = vmatprep.subr.bf16.mxu0 %v4723_v46  ;;  %v289_v17 = vld [vmem:[#allocation7 + $0x268] sm:$0xff]  ;;  %v292_v19 = vld [vmem:[#allocation7 + $0x280] sm:$0xff]  ;;  %v4755_v22 = vcombine.high %v284_v13, %v288_v15  ;;  %v4754_v26 = vcombine.low %v284_v13, %v288_v15  ;;  %v4813_v15 = vcombine.high %v5719_v63, %v5721_v0 }
  0x70   :  { %3500 = vmatprep.subr.bf16.mxu1 %v4725_v47  ;;  %v296_v20 = vld [vmem:[#allocation7 + $0x2a0] sm:$0xff]  ;;  %v4757_v23 = vcombine.high %v285_v16, %v289_v17  ;;  %v293_v24 = vld [vmem:[#allocation7 + $0x288] sm:$0xff]  ;;  %v4756_v29 = vcombine.low %v285_v16, %v289_v17  ;;  %v99_v16 = vlaneseq }
  0x71   :  { %v297_v25 = vld [vmem:[#allocation7 + $0x2a8] sm:$0xff]  ;;  %v300_v27 = vld [vmem:[#allocation7 + $0x2c0] sm:$0xff]  ;;  %v4763_v30 = vcombine.high %v292_v19, %v296_v20  ;;  %v4762_v34 = vcombine.low %v292_v19, %v296_v20 }
  0x72   :  { %3337 = vmatpush1.bf16.msra.mxu0 %v4722_v52  ;;  %v304_v28 = vld [vmem:[#allocation7 + $0x2e0] sm:$0xff]  ;;  %v4765_v31 = vcombine.high %v293_v24, %v297_v25  ;;  %v301_v32 = vld [vmem:[#allocation7 + $0x2c8] sm:$0xff]  ;;  %v4764_v37 = vcombine.low %v293_v24, %v297_v25  ;;  %v100_v17 = vshrl.u32 %v99_v16, 7  ;;  %v91_v24 = vld [vmem:[#allocation5] sm:$0xff] }
  0x73   :  { %3501 = vmatpush1.bf16.msra.mxu1 %v4724_v53  ;;  %3338 = vmatprep.subr.bf16.mxu0 %v4731_v54  ;;  %v305_v33 = vld [vmem:[#allocation7 + $0x2e8] sm:$0xff]  ;;  %v308_v35 = vld [vmem:[#allocation7 + $0x300] sm:$0xff]  ;;  %v4771_v38 = vcombine.high %v300_v27, %v304_v28  ;;  %v4770_v42 = vcombine.low %v300_v27, %v304_v28 }
  0x74   :  { %3502 = vmatprep.subr.bf16.mxu1 %v4733_v57  ;;  %v312_v36 = vld [vmem:[#allocation7 + $0x320] sm:$0xff]  ;;  %v4773_v39 = vcombine.high %v301_v32, %v305_v33  ;;  %v309_v40 = vld [vmem:[#allocation7 + $0x308] sm:$0xff]  ;;  %v4772_v45 = vcombine.low %v301_v32, %v305_v33  ;;  %v5731_v19 = vsub.s32 0, %v100_v17  ;;  %v5733_v20 = vsub.s32 3, %v100_v17 }
  0x75   :  { %v313_v41 = vld [vmem:[#allocation7 + $0x328] sm:$0xff]  ;;  %v316_v43 = vld [vmem:[#allocation7 + $0x340] sm:$0xff]  ;;  %v4779_v46 = vcombine.high %v308_v35, %v312_v36  ;;  %v4778_v50 = vcombine.low %v308_v35, %v312_v36  ;;  %v5739_v25 = vsub.s32 4, %v100_v17 }
  0x76   :  { %3339 = vmatpush1.bf16.msra.mxu0 %v4730_v1  ;;  %v320_v44 = vld [vmem:[#allocation7 + $0x360] sm:$0xff]  ;;  %v4781_v47 = vcombine.high %v309_v40, %v313_v41  ;;  %v317_v48 = vld [vmem:[#allocation7 + $0x348] sm:$0xff]  ;;  %v4780_v53 = vcombine.low %v309_v40, %v313_v41  ;;  %v151_v33 = vrot.slane %v91_v24, %v5731_v19  ;;  %v5755_v40 = vsub.s32 6, %v100_v17 }
  0x77   :  { %3503 = vmatpush1.bf16.msra.mxu1 %v4732_v3  ;;  %3340 = vmatprep.subr.bf16.mxu0 %v4739_v4  ;;  %v321_v49 = vld [vmem:[#allocation7 + $0x368] sm:$0xff]  ;;  %v324_v51 = vld [vmem:[#allocation7 + $0x380] sm:$0xff]  ;;  %v4787_v54 = vcombine.high %v316_v43, %v320_v44  ;;  %v4786_v58 = vcombine.low %v316_v43, %v320_v44 }
  0x78   :  { %3504 = vmatprep.subr.bf16.mxu1 %v4741_v5  ;;  %v328_v52 = vld [vmem:[#allocation7 + $0x3a0] sm:$0xff]  ;;  %v4789_v55 = vcombine.high %v317_v48, %v321_v49  ;;  %v325_v56 = vld [vmem:[#allocation7 + $0x388] sm:$0xff]  ;;  %v4788_v3 = vcombine.low %v317_v48, %v321_v49 }
  0x79   :  { %v329_v57 = vld [vmem:[#allocation7 + $0x3a8] sm:$0xff]  ;;  %v332_v61 = vld [vmem:[#allocation7 + $0x3c0] sm:$0xff]  ;;  %v4795_v4 = vcombine.high %v324_v51, %v328_v52  ;;  %v4794_v8 = vcombine.low %v324_v51, %v328_v52 }
  0x7a   :  { %3341 = vmatpush1.bf16.msra.mxu0 %v4738_v10  ;;  %v336_v1 = vld [vmem:[#allocation7 + $0x3e0] sm:$0xff]  ;;  %v4797_v5 = vcombine.high %v325_v56, %v329_v57  ;;  %v333_v6 = vld [vmem:[#allocation7 + $0x3c8] sm:$0xff]  ;;  %v4796_v9 = vcombine.low %v325_v56, %v329_v57 }
  0x7b   :  { %3505 = vmatpush1.bf16.msra.mxu1 %v4740_v11  ;;  %3342 = vmatprep.subr.bf16.mxu0 %v4747_v12  ;;  %v337_v7 = vld [vmem:[#allocation7 + $0x3e8] sm:$0xff]  ;;  %v4803_v10 = vcombine.high %v332_v61, %v336_v1  ;;  %v4802_v12 = vcombine.low %v332_v61, %v336_v1  ;;  %v348_v57 = vld [vmem:[#allocation7 + $0x440] sm:$0xff] }
  0x7c   :  { %3506 = vmatprep.subr.bf16.mxu1 %v4749_v14  ;;  %v4805_v11 = vcombine.high %v333_v6, %v337_v7  ;;  %v4804_v13 = vcombine.low %v333_v6, %v337_v7  ;;  %v4811_v14 = vcombine.high %v5713_v59, %v5715_v60  ;;  %v352_v1 = vld [vmem:[#allocation7 + $0x460] sm:$0xff]  ;;  %v175_v7 = vrot.slane %v91_v24, %v5755_v40  ;;  %v365_v59 = vld [vmem:[#allocation7 + $0x4c8] sm:$0xff] }
  0x7d   :  { %v369_v60 = vld [vmem:[#allocation7 + $0x4e8] sm:$0xff] }
  0x7e   :  { %3343 = vmatpush1.bf16.msra.mxu0 %v4746_v18  ;;  %v5729_v18 = vsub.s32 1, %v100_v17 }
  0x7f   :  { %3507 = vmatpush1.bf16.msra.mxu1 %v4748_v21  ;;  %3344 = vmatprep.subr.bf16.mxu0 %v4755_v22  ;;  %v5735_v21 = vsub.s32 2, %v100_v17  ;;  %v92_v22 = vld [vmem:[#allocation3] sm:$0xff] }
  0x80   :  { %3508 = vmatprep.subr.bf16.mxu1 %v4757_v23  ;;  %v5737_v23 = vsub.s32 5, %v100_v17  ;;  %v106_v27 = vrot.slane %v92_v22, %v5729_v18  ;;  %v102_v28 = vrot.slane %v92_v22, %v5731_v19  ;;  %v155_v32 = vrot.slane %v91_v24, %v5729_v18 }
  0x81   :  { %v159_v35 = vrot.slane %v91_v24, %v5735_v21 }
  0x82   :  { %3345 = vmatpush1.bf16.msra.mxu0 %v4754_v26  ;;  %v5741_v26 = vsub.s32 7, %v100_v17 }
  0x83   :  { %3509 = vmatpush1.bf16.msra.mxu1 %v4756_v29  ;;  %3346 = vmatprep.subr.bf16.mxu0 %v4763_v30  ;;  %v114_v29 = vrot.slane %v92_v22, %v5733_v20  ;;  %v110_v30 = vrot.slane %v92_v22, %v5735_v21 }
  0x84   :  { %3510 = vmatprep.subr.bf16.mxu1 %v4765_v31  ;;  %v122_v31 = vrot.slane %v92_v22, %v5737_v23 }
  0x86   :  { %3347 = vmatpush1.bf16.msra.mxu0 %v4762_v34  ;;  %v163_v34 = vrot.slane %v91_v24, %v5733_v20 }
  0x87   :  { %3511 = vmatpush1.bf16.msra.mxu1 %v4764_v37  ;;  %3348 = vmatprep.subr.bf16.mxu0 %v4771_v38  ;;  %v171_v37 = vrot.slane %v91_v24, %v5737_v23  ;;  %v118_v38 = vrot.slane %v92_v22, %v5739_v25 }
  0x88   :  { %3512 = vmatprep.subr.bf16.mxu1 %v4773_v39  ;;  %v130_v39 = vrot.slane %v92_v22, %v5741_v26 }
  0x8a   :  { %3349 = vmatpush1.bf16.msra.mxu0 %v4770_v42 }
  0x8b   :  { %3513 = vmatpush1.bf16.msra.mxu1 %v4772_v45  ;;  %3350 = vmatprep.subr.bf16.mxu0 %v4779_v46  ;;  %v167_v46 = vrot.slane %v91_v24, %v5739_v25 }
  0x8c   :  { %3514 = vmatprep.subr.bf16.mxu1 %v4781_v47 }
  0x8e   :  { %3351 = vmatpush1.bf16.msra.mxu0 %v4778_v50 }
  0x8f   :  { %3515 = vmatpush1.bf16.msra.mxu1 %v4780_v53  ;;  %3352 = vmatprep.subr.bf16.mxu0 %v4787_v54  ;;  %v179_v54 = vrot.slane %v91_v24, %v5741_v26 }
  0x90   :  { %3516 = vmatprep.subr.bf16.mxu1 %v4789_v55 }
  0x92   :  { %3353 = vmatpush1.bf16.msra.mxu0 %v4786_v58  ;;  %v126_v58 = vrot.slane %v92_v22, %v5755_v40  ;;  %v4818_v22 = vcombine.low %v348_v57, %v352_v1 }
  0x93   :  { %3517 = vmatpush1.bf16.msra.mxu1 %v4788_v3  ;;  %3354 = vmatprep.subr.bf16.mxu0 %v4795_v4  ;;  %v349_v3 = vld [vmem:[#allocation7 + $0x448] sm:$0xff] }
  0x94   :  { %3518 = vmatprep.subr.bf16.mxu1 %v4797_v5  ;;  %v353_v4 = vld [vmem:[#allocation7 + $0x468] sm:$0xff] }
  0x95   :  { %v4820_v24 = vcombine.low %v349_v3, %v353_v4 }
  0x96   :  { %3355 = vmatpush1.bf16.msra.mxu0 %v4794_v8  ;;  %v356_v8 = vld [vmem:[#allocation7 + $0x480] sm:$0xff] }
  0x97   :  { %3519 = vmatpush1.bf16.msra.mxu1 %v4796_v9  ;;  %3356 = vmatprep.subr.bf16.mxu0 %v4803_v10 }
  0x98   :  { %3520 = vmatprep.subr.bf16.mxu1 %v4805_v11  ;;  %v4819_v11 = vcombine.high %v348_v57, %v352_v1  ;;  %v400_v1 = vld [vmem:[#allocation7 + $0x5e0] sm:$0xff] }
  0x9a   :  { %3357 = vmatpush1.bf16.msra.mxu0 %v4802_v12  ;;  %v4821_v12 = vcombine.high %v349_v3, %v353_v4  ;;  %v397_v3 = vld [vmem:[#allocation7 + $0x5c8] sm:$0xff] }
  0x9b   :  { %3521 = vmatpush1.bf16.msra.mxu1 %v4804_v13  ;;  %3367 = vmatprep.subr.bf16.mxu0 %v4811_v14  ;;  %v360_v13 = vld [vmem:[#allocation7 + $0x4a0] sm:$0xff]  ;;  %v357_v14 = vld [vmem:[#allocation7 + $0x488] sm:$0xff] }
  0x9c   :  { %3531 = vmatprep.subr.bf16.mxu1 %v4813_v15  ;;  %v361_v15 = vld [vmem:[#allocation7 + $0x4a8] sm:$0xff] }
  0x9d   :  { %v4828_v63 = vcombine.low %v357_v14, %v361_v15  ;;  %v401_v4 = vld [vmem:[#allocation7 + $0x5e8] sm:$0xff] }
  0xda   :  { %v96_v36 = vpop.permute.xlu0 %95 }
  0xdb   :  { %v140_v41 = vmul.f32 %v106_v27, %v96_v36  ;;  %v139_v42 = vmul.f32 %v102_v28, %v96_v36  ;;  %v142_v43 = vmul.f32 %v114_v29, %v96_v36  ;;  %v141_v44 = vmul.f32 %v110_v30, %v96_v36  ;;  %v364_v30 = vld [vmem:[#allocation7 + $0x4c0] sm:$0xff] }
  0xdc   :  { %v144_v45 = vmul.f32 %v122_v31, %v96_v36  ;;  %v143_v52 = vmul.f32 %v118_v38, %v96_v36  ;;  %v146_v53 = vmul.f32 %v130_v39, %v96_v36  ;;  %v145_v16 = vmul.f32 %v126_v58, %v96_v36  ;;  %v368_v31 = vld [vmem:[#allocation7 + $0x4e0] sm:$0xff] }
  0xdd   :  { %v189_v47 = vadd.f32 %v155_v32, %v140_v41  ;;  %v188_v48 = vadd.f32 %v151_v33, %v139_v42  ;;  %v191_v49 = vadd.f32 %v163_v34, %v142_v43  ;;  %v5758_v50 = vadd.f32 %v159_v35, %v141_v44  ;;  %v372_v32 = vld [vmem:[#allocation7 + $0x500] sm:$0xff]  ;;  %v373_v34 = vld [vmem:[#allocation7 + $0x508] sm:$0xff] }
  0xde   :  { %v5760_v51 = vadd.f32 %v171_v37, %v144_v45  ;;  %v5769_v9 = vadd.f32 %v167_v46, %v143_v52  ;;  %v5771_v10 = vadd.f32 %v179_v54, %v146_v53  ;;  %v5785_v27 = vadd.f32 %v175_v7, %v145_v16  ;;  %v376_v33 = vld [vmem:[#allocation7 + $0x520] sm:$0xff]  ;;  %v377_v35 = vld [vmem:[#allocation7 + $0x528] sm:$0xff] }
  0xdf   :  { %v197_v55 = vmax.f32 %v189_v47, 0.0  ;;  %v196_v56 = vmax.f32 %v188_v48, 0.0  ;;  %v199_v61 = vmax.f32 %v191_v49, 0.0  ;;  %v4827_v28 = vcombine.high %v356_v8, %v360_v13  ;;  %v380_v41 = vld [vmem:[#allocation7 + $0x540] sm:$0xff]  ;;  %v381_v43 = vld [vmem:[#allocation7 + $0x548] sm:$0xff] }
  0xe0   :  { %v4829_v29 = vcombine.high %v357_v14, %v361_v15  ;;  %v4835_v0 = vcombine.high %v364_v30, %v368_v31  ;;  %v4834_v36 = vcombine.low %v364_v30, %v368_v31  ;;  %v4836_v37 = vcombine.low %v365_v59, %v369_v60  ;;  %v384_v42 = vld [vmem:[#allocation7 + $0x560] sm:$0xff]  ;;  %v385_v44 = vld [vmem:[#allocation7 + $0x568] sm:$0xff] }
  0xe1   :  { %v5764_v5 = vpack.c.bf16 %v197_v55, %v197_v55  ;;  %v5766_v6 = vpack.c.bf16 %v196_v56, %v196_v56  ;;  %v5777_v17 = vpack.c.bf16 %v199_v61, %v199_v61  ;;  %v4843_v38 = vcombine.high %v372_v32, %v376_v33  ;;  %v388_v49 = vld [vmem:[#allocation7 + $0x580] sm:$0xff]  ;;  %v389_v53 = vld [vmem:[#allocation7 + $0x588] sm:$0xff] }
  0xe2   :  { %v4845_v39 = vcombine.high %v373_v34, %v377_v35  ;;  %v4842_v45 = vcombine.low %v372_v32, %v376_v33  ;;  %v4844_v46 = vcombine.low %v373_v34, %v377_v35  ;;  %v4851_v47 = vcombine.high %v380_v41, %v384_v42  ;;  %v392_v52 = vld [vmem:[#allocation7 + $0x5a0] sm:$0xff]  ;;  %v393_v54 = vld [vmem:[#allocation7 + $0x5a8] sm:$0xff] }
  0xe3   :  { %3358 = vmatprep.mubr.bf16.mxu0 %v5764_v5  ;;  %3522 = vmatprep.mubr.bf16.mxu1 %v5764_v5  ;;  %v4853_v48 = vcombine.high %v381_v43, %v385_v44  ;;  %v4850_v55 = vcombine.low %v380_v41, %v384_v42  ;;  %v4852_v56 = vcombine.low %v381_v43, %v385_v44  ;;  %v396_v61 = vld [vmem:[#allocation7 + $0x5c0] sm:$0xff]  ;;  %v405_v15 = vld [vmem:[#allocation7 + $0x608] sm:$0xff] }
  0xe4   :  { %3359 = vmatmul.mubr.bf16.vlgmr.msra.gmra.mrb[0].mxu0 %v5766_v6  ;;  %3523 = vmatmul.mubr.bf16.vlgmr.msra.gmra.mrb[0].mxu1 %v5766_v6  ;;  %v4859_v57 = vcombine.high %v388_v49, %v392_v52  ;;  %v4861_v58 = vcombine.high %v389_v53, %v393_v54  ;;  %v4858_v7 = vcombine.low %v388_v49, %v392_v52  ;;  %v408_v14 = vld [vmem:[#allocation7 + $0x620] sm:$0xff]  ;;  %v409_v16 = vld [vmem:[#allocation7 + $0x628] sm:$0xff] }
  0xe5   :  { %3368 = vmatpush1.bf16.msra.mxu0 %v4810_v62  ;;  %3532 = vmatpush1.bf16.msra.mxu1 %v4812_v2  ;;  %v4826_v62 = vcombine.low %v356_v8, %v360_v13  ;;  %v4837_v2 = vcombine.high %v365_v59, %v369_v60  ;;  %v4860_v8 = vcombine.low %v389_v53, %v393_v54  ;;  %v404_v13 = vld [vmem:[#allocation7 + $0x600] sm:$0xff]  ;;  %v413_v59 = vld [vmem:[#allocation7 + $0x648] sm:$0xff] }
  0xe6   :  { %3399 = vmatprep.mubr.bf16.mxu0 %v5777_v17  ;;  %3563 = vmatprep.mubr.bf16.mxu1 %v5777_v17  ;;  %v412_v30 = vld [vmem:[#allocation7 + $0x640] sm:$0xff]  ;;  %v417_v60 = vld [vmem:[#allocation7 + $0x668] sm:$0xff] }
  0xe7   :  { %3369 = vmatprep.subr.bf16.mxu0 %v4819_v11  ;;  %3533 = vmatprep.subr.bf16.mxu1 %v4821_v12  ;;  %v4867_v11 = vcombine.high %v396_v61, %v400_v1  ;;  %v4869_v12 = vcombine.high %v397_v3, %v401_v4  ;;  %v416_v31 = vld [vmem:[#allocation7 + $0x660] sm:$0xff]  ;;  %v421_v34 = vld [vmem:[#allocation7 + $0x688] sm:$0xff] }
  0xe8   :  { %v420_v32 = vld [vmem:[#allocation7 + $0x680] sm:$0xff]  ;;  %v425_v35 = vld [vmem:[#allocation7 + $0x6a8] sm:$0xff] }
  0xe9   :  { %3370 = vmatpush1.bf16.msra.mxu0 %v4818_v22  ;;  %3534 = vmatpush1.bf16.msra.mxu1 %v4820_v24  ;;  %v4866_v22 = vcombine.low %v396_v61, %v400_v1  ;;  %v4868_v24 = vcombine.low %v397_v3, %v401_v4  ;;  %v424_v33 = vld [vmem:[#allocation7 + $0x6a0] sm:$0xff]  ;;  %v429_v43 = vld [vmem:[#allocation7 + $0x6c8] sm:$0xff] }
  0xea   :  { %3371 = vmatprep.subr.bf16.mxu0 %v4827_v28  ;;  %3535 = vmatprep.subr.bf16.mxu1 %v4829_v29  ;;  %v4875_v28 = vcombine.high %v404_v13, %v408_v14  ;;  %v4877_v29 = vcombine.high %v405_v15, %v409_v16  ;;  %v428_v41 = vld [vmem:[#allocation7 + $0x6c0] sm:$0xff]  ;;  %v433_v44 = vld [vmem:[#allocation7 + $0x6e8] sm:$0xff] }
  0xeb   :  { %v432_v42 = vld [vmem:[#allocation7 + $0x6e0] sm:$0xff]  ;;  %v437_v53 = vld [vmem:[#allocation7 + $0x708] sm:$0xff] }
  0xec   :  { %v436_v49 = vld [vmem:[#allocation7 + $0x700] sm:$0xff]  ;;  %v441_v54 = vld [vmem:[#allocation7 + $0x728] sm:$0xff] }
  0xed   :  { %3372 = vmatpush1.bf16.msra.mxu0 %v4826_v62  ;;  %3536 = vmatpush1.bf16.msra.mxu1 %v4828_v63  ;;  %v4874_v62 = vcombine.low %v404_v13, %v408_v14  ;;  %v4876_v63 = vcombine.low %v405_v15, %v409_v16  ;;  %v440_v52 = vld [vmem:[#allocation7 + $0x720] sm:$0xff]  ;;  %v445_v3 = vld [vmem:[#allocation7 + $0x748] sm:$0xff] }
  0xee   :  { %3373 = vmatprep.subr.bf16.mxu0 %v4835_v0  ;;  %3537 = vmatprep.subr.bf16.mxu1 %v4837_v2  ;;  %v4883_v0 = vcombine.high %v412_v30, %v416_v31  ;;  %v4885_v2 = vcombine.high %v413_v59, %v417_v60  ;;  %v444_v61 = vld [vmem:[#allocation7 + $0x740] sm:$0xff]  ;;  %v449_v4 = vld [vmem:[#allocation7 + $0x768] sm:$0xff] }
  0xef   :  { %v448_v1 = vld [vmem:[#allocation7 + $0x760] sm:$0xff]  ;;  %v453_v15 = vld [vmem:[#allocation7 + $0x788] sm:$0xff] }
  0xf0   :  { %v452_v13 = vld [vmem:[#allocation7 + $0x780] sm:$0xff]  ;;  %v457_v16 = vld [vmem:[#allocation7 + $0x7a8] sm:$0xff] }
  0xf1   :  { %3374 = vmatpush1.bf16.msra.mxu0 %v4834_v36  ;;  %3538 = vmatpush1.bf16.msra.mxu1 %v4836_v37  ;;  %v4882_v36 = vcombine.low %v412_v30, %v416_v31  ;;  %v4884_v37 = vcombine.low %v413_v59, %v417_v60  ;;  %v456_v14 = vld [vmem:[#allocation7 + $0x7a0] sm:$0xff]  ;;  %v461_v59 = vld [vmem:[#allocation7 + $0x7c8] sm:$0xff] }
  0xf2   :  { %3375 = vmatprep.subr.bf16.mxu0 %v4843_v38  ;;  %3539 = vmatprep.subr.bf16.mxu1 %v4845_v39  ;;  %v4891_v38 = vcombine.high %v420_v32, %v424_v33  ;;  %v4893_v39 = vcombine.high %v421_v34, %v425_v35  ;;  %v460_v30 = vld [vmem:[#allocation7 + $0x7c0] sm:$0xff]  ;;  %v465_v60 = vld [vmem:[#allocation7 + $0x7e8] sm:$0xff] }
  0xf3   :  { %v464_v31 = vld [vmem:[#allocation7 + $0x7e0] sm:$0xff] }
  0xf5   :  { %3376 = vmatpush1.bf16.msra.mxu0 %v4842_v45  ;;  %3540 = vmatpush1.bf16.msra.mxu1 %v4844_v46  ;;  %v4890_v45 = vcombine.low %v420_v32, %v424_v33  ;;  %v4892_v46 = vcombine.low %v421_v34, %v425_v35  ;;  %v468_v32 = vld [vmem:[#allocation7 + $0x800] sm:$0xff]  ;;  %v469_v34 = vld [vmem:[#allocation7 + $0x808] sm:$0xff] }
  0xf6   :  { %3377 = vmatprep.subr.bf16.mxu0 %v4851_v47  ;;  %3541 = vmatprep.subr.bf16.mxu1 %v4853_v48  ;;  %v4899_v47 = vcombine.high %v428_v41, %v432_v42  ;;  %v4901_v48 = vcombine.high %v429_v43, %v433_v44  ;;  %v472_v33 = vld [vmem:[#allocation7 + $0x820] sm:$0xff]  ;;  %v473_v35 = vld [vmem:[#allocation7 + $0x828] sm:$0xff] }
  0xf9   :  { %3378 = vmatpush1.bf16.msra.mxu0 %v4850_v55  ;;  %3542 = vmatpush1.bf16.msra.mxu1 %v4852_v56  ;;  %v4898_v55 = vcombine.low %v428_v41, %v432_v42  ;;  %v4900_v56 = vcombine.low %v429_v43, %v433_v44  ;;  %v4941_v41 = vcombine.high %v469_v34, %v473_v35  ;;  %v201_v42 = vmax.f32 %v5760_v51, 0.0  ;;  %v476_v43 = vld [vmem:[#allocation7 + $0x840] sm:$0xff]  ;;  %v485_v51 = vld [vmem:[#allocation7 + $0x888] sm:$0xff] }
  0xfa   :  { %3379 = vmatprep.subr.bf16.mxu0 %v4859_v57  ;;  %3543 = vmatprep.subr.bf16.mxu1 %v4861_v58  ;;  %v4907_v57 = vcombine.high %v436_v49, %v440_v52  ;;  %v4909_v58 = vcombine.high %v437_v53, %v441_v54  ;;  %v480_v44 = vld [vmem:[#allocation7 + $0x860] sm:$0xff] }
  0xfd   :  { %3380 = vmatpush1.bf16.msra.mxu0 %v4858_v7  ;;  %3544 = vmatpush1.bf16.msra.mxu1 %v4860_v8  ;;  %v4906_v7 = vcombine.low %v436_v49, %v440_v52  ;;  %v4908_v8 = vcombine.low %v437_v53, %v441_v54  ;;  %v4940_v49 = vcombine.low %v469_v34, %v473_v35  ;;  %v484_v54 = vld [vmem:[#allocation7 + $0x880] sm:$0xff] }
  0xfe   :  { %3381 = vmatprep.subr.bf16.mxu0 %v4867_v11  ;;  %3545 = vmatprep.subr.bf16.mxu1 %v4869_v12  ;;  %v4915_v11 = vcombine.high %v444_v61, %v448_v1  ;;  %v4917_v12 = vcombine.high %v445_v3, %v449_v4  ;;  %v5793_v52 = vpack.c.bf16 %v201_v42, %v201_v42  ;;  %v516_v34 = vld [vmem:[#allocation7 + $0x980] sm:$0xff] }
  0xff   :  { %v4947_v53 = vcombine.high %v476_v43, %v480_v44  ;;  %v520_v35 = vld [vmem:[#allocation7 + $0x9a0] sm:$0xff] }
 0x101   :  { %3382 = vmatpush1.bf16.msra.mxu0 %v4866_v22  ;;  %3546 = vmatpush1.bf16.msra.mxu1 %v4868_v24  ;;  %v4914_v22 = vcombine.low %v444_v61, %v448_v1  ;;  %v4916_v24 = vcombine.low %v445_v3, %v449_v4  ;;  %v492_v3 = vld [vmem:[#allocation7 + $0x8c0] sm:$0xff] }
 0x102   :  { %3383 = vmatprep.subr.bf16.mxu0 %v4875_v28  ;;  %3547 = vmatprep.subr.bf16.mxu1 %v4877_v29  ;;  %v4923_v28 = vcombine.high %v452_v13, %v456_v14  ;;  %v4925_v29 = vcombine.high %v453_v15, %v457_v16  ;;  %v496_v4 = vld [vmem:[#allocation7 + $0x8e0] sm:$0xff] }
 0x105   :  { %3384 = vmatpush1.bf16.msra.mxu0 %v4874_v62  ;;  %3548 = vmatpush1.bf16.msra.mxu1 %v4876_v63  ;;  %v4922_v62 = vcombine.low %v452_v13, %v456_v14  ;;  %v4924_v63 = vcombine.low %v453_v15, %v457_v16  ;;  %v4963_v13 = vcombine.high %v492_v3, %v496_v4  ;;  %v500_v15 = vld [vmem:[#allocation7 + $0x900] sm:$0xff] }
 0x106   :  { %3385 = vmatprep.subr.bf16.mxu0 %v4883_v0  ;;  %3549 = vmatprep.subr.bf16.mxu1 %v4885_v2  ;;  %v4931_v0 = vcombine.high %v460_v30, %v464_v31  ;;  %v4933_v2 = vcombine.high %v461_v59, %v465_v60  ;;  %v504_v16 = vld [vmem:[#allocation7 + $0x920] sm:$0xff] }
 0x109   :  { %3386 = vmatpush1.bf16.msra.mxu0 %v4882_v36  ;;  %3550 = vmatpush1.bf16.msra.mxu1 %v4884_v37  ;;  %v4930_v36 = vcombine.low %v460_v30, %v464_v31  ;;  %v4932_v37 = vcombine.low %v461_v59, %v465_v60  ;;  %v4971_v30 = vcombine.high %v500_v15, %v504_v16  ;;  %v508_v59 = vld [vmem:[#allocation7 + $0x940] sm:$0xff] }
 0x10a   :  { %3387 = vmatprep.subr.bf16.mxu0 %v4891_v38  ;;  %3551 = vmatprep.subr.bf16.mxu1 %v4893_v39  ;;  %v198_v38 = vmax.f32 %v5758_v50, 0.0  ;;  %v4939_v39 = vcombine.high %v468_v32, %v472_v33  ;;  %v512_v60 = vld [vmem:[#allocation7 + $0x960] sm:$0xff] }
 0x10d   :  { %3388 = vmatpush1.bf16.msra.mxu0 %v4890_v45  ;;  %3552 = vmatpush1.bf16.msra.mxu1 %v4892_v46  ;;  %v477_v45 = vld [vmem:[#allocation7 + $0x848] sm:$0xff] }
 0x10e   :  { %3389 = vmatprep.subr.bf16.mxu0 %v4899_v47  ;;  %3553 = vmatprep.subr.bf16.mxu1 %v4901_v48  ;;  %v481_v46 = vld [vmem:[#allocation7 + $0x868] sm:$0xff]  ;;  %v4938_v47 = vcombine.low %v468_v32, %v472_v33  ;;  %v5791_v48 = vpack.c.bf16 %v198_v38, %v198_v38  ;;  %v4979_v32 = vcombine.high %v508_v59, %v512_v60 }
 0x10f   :  { %v4949_v50 = vcombine.high %v477_v45, %v481_v46  ;;  %v4978_v38 = vcombine.low %v508_v59, %v512_v60  ;;  %v556_v59 = vld [vmem:[#allocation7 + $0xac0] sm:$0xff] }
 0x110   :  { %v560_v60 = vld [vmem:[#allocation7 + $0xae0] sm:$0xff] }
 0x111   :  { %3390 = vmatpush1.bf16.msra.mxu0 %v4898_v55  ;;  %3554 = vmatpush1.bf16.msra.mxu1 %v4900_v56  ;;  %v488_v55 = vld [vmem:[#allocation7 + $0x8a0] sm:$0xff]  ;;  %v489_v56 = vld [vmem:[#allocation7 + $0x8a8] sm:$0xff] }
 0x112   :  { %3391 = vmatprep.subr.bf16.mxu0 %v4907_v57  ;;  %3555 = vmatprep.subr.bf16.mxu1 %v4909_v58  ;;  %v4946_v57 = vcombine.low %v476_v43, %v480_v44  ;;  %v4948_v58 = vcombine.low %v477_v45, %v481_v46  ;;  %v4955_v61 = vcombine.high %v484_v54, %v488_v55  ;;  %v524_v43 = vld [vmem:[#allocation7 + $0x9c0] sm:$0xff]  ;;  %v525_v45 = vld [vmem:[#allocation7 + $0x9c8] sm:$0xff] }
 0x113   :  { %v4957_v1 = vcombine.high %v485_v51, %v489_v56  ;;  %v528_v44 = vld [vmem:[#allocation7 + $0x9e0] sm:$0xff]  ;;  %v529_v46 = vld [vmem:[#allocation7 + $0x9e8] sm:$0xff] }
 0x115   :  { %3392 = vmatpush1.bf16.msra.mxu0 %v4906_v7  ;;  %3556 = vmatpush1.bf16.msra.mxu1 %v4908_v8  ;;  %v493_v7 = vld [vmem:[#allocation7 + $0x8c8] sm:$0xff] }
 0x116   :  { %3393 = vmatprep.subr.bf16.mxu0 %v4915_v11  ;;  %3557 = vmatprep.subr.bf16.mxu1 %v4917_v12  ;;  %v497_v8 = vld [vmem:[#allocation7 + $0x8e8] sm:$0xff]  ;;  %v4954_v11 = vcombine.low %v484_v54, %v488_v55  ;;  %v4956_v12 = vcombine.low %v485_v51, %v489_v56  ;;  %v532_v54 = vld [vmem:[#allocation7 + $0xa00] sm:$0xff] }
 0x117   :  { %v4965_v14 = vcombine.high %v493_v7, %v497_v8  ;;  %v536_v55 = vld [vmem:[#allocation7 + $0xa20] sm:$0xff]  ;;  %v533_v51 = vld [vmem:[#allocation7 + $0xa08] sm:$0xff] }
 0x118   :  { %v537_v56 = vld [vmem:[#allocation7 + $0xa28] sm:$0xff] }
 0x119   :  { %3394 = vmatpush1.bf16.msra.mxu0 %v4914_v22  ;;  %3558 = vmatpush1.bf16.msra.mxu1 %v4916_v24  ;;  %v501_v22 = vld [vmem:[#allocation7 + $0x908] sm:$0xff] }
 0x11a   :  { %3395 = vmatprep.subr.bf16.mxu0 %v4923_v28  ;;  %3559 = vmatprep.subr.bf16.mxu1 %v4925_v29  ;;  %v505_v24 = vld [vmem:[#allocation7 + $0x928] sm:$0xff]  ;;  %v4962_v28 = vcombine.low %v492_v3, %v496_v4  ;;  %v4964_v29 = vcombine.low %v493_v7, %v497_v8  ;;  %v540_v3 = vld [vmem:[#allocation7 + $0xa40] sm:$0xff] }
 0x11b   :  { %v4973_v31 = vcombine.high %v501_v22, %v505_v24  ;;  %v544_v4 = vld [vmem:[#allocation7 + $0xa60] sm:$0xff]  ;;  %v541_v7 = vld [vmem:[#allocation7 + $0xa48] sm:$0xff] }
 0x11c   :  { %v545_v8 = vld [vmem:[#allocation7 + $0xa68] sm:$0xff] }
 0x11d   :  { %3396 = vmatpush1.bf16.msra.mxu0 %v4922_v62  ;;  %3560 = vmatpush1.bf16.msra.mxu1 %v4924_v63  ;;  %v509_v62 = vld [vmem:[#allocation7 + $0x948] sm:$0xff] }
 0x11e   :  { %3397 = vmatprep.subr.bf16.mxu0 %v4931_v0  ;;  %3561 = vmatprep.subr.bf16.mxu1 %v4933_v2  ;;  %v513_v63 = vld [vmem:[#allocation7 + $0x968] sm:$0xff]  ;;  %v4970_v0 = vcombine.low %v500_v15, %v504_v16  ;;  %v4972_v2 = vcombine.low %v501_v22, %v505_v24  ;;  %v548_v15 = vld [vmem:[#allocation7 + $0xa80] sm:$0xff] }
 0x11f   :  { %v4981_v33 = vcombine.high %v509_v62, %v513_v63  ;;  %v552_v16 = vld [vmem:[#allocation7 + $0xaa0] sm:$0xff]  ;;  %v549_v22 = vld [vmem:[#allocation7 + $0xa88] sm:$0xff] }
 0x120   :  { %v553_v24 = vld [vmem:[#allocation7 + $0xaa8] sm:$0xff] }
 0x121   :  { %3398 = vmatpush1.bf16.msra.mxu0 %v4930_v36  ;;  %3562 = vmatpush1.bf16.msra.mxu1 %v4932_v37  ;;  %v517_v36 = vld [vmem:[#allocation7 + $0x988] sm:$0xff] }
 0x122   :  { %3408 = vmatprep.subr.bf16.mxu0 %v4939_v39  ;;  %3572 = vmatprep.subr.bf16.mxu1 %v4941_v41  ;;  %v521_v37 = vld [vmem:[#allocation7 + $0x9a8] sm:$0xff]  ;;  %v4980_v39 = vcombine.low %v509_v62, %v513_v63  ;;  %v4987_v41 = vcombine.high %v516_v34, %v520_v35 }
 0x123   :  { %v4989_v42 = vcombine.high %v517_v36, %v521_v37  ;;  %v557_v62 = vld [vmem:[#allocation7 + $0xac8] sm:$0xff] }
 0x124   :  { %3400 = vmatmul.mubr.bf16.vlgmr.msra.gmra.mrb[0].mxu0 %v5791_v48  ;;  %3564 = vmatmul.mubr.bf16.vlgmr.msra.gmra.mrb[0].mxu1 %v5791_v48  ;;  %v561_v63 = vld [vmem:[#allocation7 + $0xae8] sm:$0xff] }
 0x125   :  { %3409 = vmatpush1.bf16.msra.mxu0 %v4938_v47  ;;  %3440 = vmatprep.mubr.bf16.mxu0 %v5793_v52  ;;  %v4986_v47 = vcombine.low %v516_v34, %v520_v35  ;;  %v564_v34 = vld [vmem:[#allocation7 + $0xb00] sm:$0xff] }
 0x126   :  { %3573 = vmatpush1.bf16.msra.mxu1 %v4940_v49  ;;  %3604 = vmatprep.mubr.bf16.mxu1 %v5793_v52  ;;  %v4988_v49 = vcombine.low %v517_v36, %v521_v37  ;;  %v568_v35 = vld [vmem:[#allocation7 + $0xb20] sm:$0xff]  ;;  %v565_v36 = vld [vmem:[#allocation7 + $0xb08] sm:$0xff] }
 0x127   :  { %3410 = vmatprep.subr.bf16.mxu0 %v4947_v53  ;;  %3574 = vmatprep.subr.bf16.mxu1 %v4949_v50  ;;  %v4995_v53 = vcombine.high %v524_v43, %v528_v44  ;;  %v4997_v50 = vcombine.high %v525_v45, %v529_v46  ;;  %v569_v37 = vld [vmem:[#allocation7 + $0xb28] sm:$0xff] }
 0x129   :  { %3411 = vmatpush1.bf16.msra.mxu0 %v4946_v57  ;;  %v4994_v57 = vcombine.low %v524_v43, %v528_v44  ;;  %v572_v43 = vld [vmem:[#allocation7 + $0xb40] sm:$0xff] }
 0x12a   :  { %3575 = vmatpush1.bf16.msra.mxu1 %v4948_v58  ;;  %3412 = vmatprep.subr.bf16.mxu0 %v4955_v61  ;;  %v4996_v58 = vcombine.low %v525_v45, %v529_v46  ;;  %v5003_v61 = vcombine.high %v532_v54, %v536_v55  ;;  %v576_v44 = vld [vmem:[#allocation7 + $0xb60] sm:$0xff]  ;;  %v573_v45 = vld [vmem:[#allocation7 + $0xb48] sm:$0xff] }
 0x12b   :  { %3576 = vmatprep.subr.bf16.mxu1 %v4957_v1  ;;  %v5005_v1 = vcombine.high %v533_v51, %v537_v56  ;;  %v577_v46 = vld [vmem:[#allocation7 + $0xb68] sm:$0xff] }
 0x12d   :  { %3413 = vmatpush1.bf16.msra.mxu0 %v4954_v11  ;;  %v5002_v11 = vcombine.low %v532_v54, %v536_v55  ;;  %v580_v54 = vld [vmem:[#allocation7 + $0xb80] sm:$0xff] }
 0x12e   :  { %3577 = vmatpush1.bf16.msra.mxu1 %v4956_v12  ;;  %3414 = vmatprep.subr.bf16.mxu0 %v4963_v13  ;;  %v5004_v12 = vcombine.low %v533_v51, %v537_v56  ;;  %v5011_v13 = vcombine.high %v540_v3, %v544_v4  ;;  %v584_v55 = vld [vmem:[#allocation7 + $0xba0] sm:$0xff]  ;;  %v581_v51 = vld [vmem:[#allocation7 + $0xb88] sm:$0xff] }
 0x12f   :  { %3578 = vmatprep.subr.bf16.mxu1 %v4965_v14  ;;  %v5013_v14 = vcombine.high %v541_v7, %v545_v8  ;;  %v585_v56 = vld [vmem:[#allocation7 + $0xba8] sm:$0xff] }
 0x131   :  { %3415 = vmatpush1.bf16.msra.mxu0 %v4962_v28  ;;  %v5010_v28 = vcombine.low %v540_v3, %v544_v4  ;;  %v588_v3 = vld [vmem:[#allocation7 + $0xbc0] sm:$0xff] }
 0x132   :  { %3579 = vmatpush1.bf16.msra.mxu1 %v4964_v29  ;;  %3416 = vmatprep.subr.bf16.mxu0 %v4971_v30  ;;  %v5012_v29 = vcombine.low %v541_v7, %v545_v8  ;;  %v5019_v30 = vcombine.high %v548_v15, %v552_v16  ;;  %v592_v4 = vld [vmem:[#allocation7 + $0xbe0] sm:$0xff]  ;;  %v589_v7 = vld [vmem:[#allocation7 + $0xbc8] sm:$0xff] }
 0x133   :  { %3580 = vmatprep.subr.bf16.mxu1 %v4973_v31  ;;  %v5021_v31 = vcombine.high %v549_v22, %v553_v24  ;;  %v593_v8 = vld [vmem:[#allocation7 + $0xbe8] sm:$0xff] }
 0x135   :  { %3417 = vmatpush1.bf16.msra.mxu0 %v4970_v0  ;;  %v5018_v0 = vcombine.low %v548_v15, %v552_v16  ;;  %v596_v15 = vld [vmem:[#allocation7 + $0xc00] sm:$0xff] }
 0x136   :  { %3581 = vmatpush1.bf16.msra.mxu1 %v4972_v2  ;;  %3418 = vmatprep.subr.bf16.mxu0 %v4979_v32  ;;  %v5020_v2 = vcombine.low %v549_v22, %v553_v24  ;;  %v5027_v32 = vcombine.high %v556_v59, %v560_v60  ;;  %v600_v16 = vld [vmem:[#allocation7 + $0xc20] sm:$0xff]  ;;  %v597_v22 = vld [vmem:[#allocation7 + $0xc08] sm:$0xff] }
 0x137   :  { %3582 = vmatprep.subr.bf16.mxu1 %v4981_v33  ;;  %v5029_v33 = vcombine.high %v557_v62, %v561_v63  ;;  %v601_v24 = vld [vmem:[#allocation7 + $0xc28] sm:$0xff] }
 0x139   :  { %3419 = vmatpush1.bf16.msra.mxu0 %v4978_v38  ;;  %v5026_v38 = vcombine.low %v556_v59, %v560_v60  ;;  %v5069_v59 = vcombine.high %v597_v22, %v601_v24  ;;  %v203_v60 = vmax.f32 %v5771_v10, 0.0 }
 0x13a   :  { %3583 = vmatpush1.bf16.msra.mxu1 %v4980_v39  ;;  %3420 = vmatprep.subr.bf16.mxu0 %v4987_v41  ;;  %v5028_v39 = vcombine.low %v557_v62, %v561_v63  ;;  %v5035_v41 = vcombine.high %v564_v34, %v568_v35  ;;  %v604_v62 = vld [vmem:[#allocation7 + $0xc40] sm:$0xff] }
 0x13b   :  { %3584 = vmatprep.subr.bf16.mxu1 %v4989_v42  ;;  %v5037_v42 = vcombine.high %v565_v36, %v569_v37  ;;  %v608_v63 = vld [vmem:[#allocation7 + $0xc60] sm:$0xff] }
 0x13d   :  { %3421 = vmatpush1.bf16.msra.mxu0 %v4986_v47  ;;  %v5034_v47 = vcombine.low %v564_v34, %v568_v35  ;;  %v5068_v34 = vcombine.low %v597_v22, %v601_v24  ;;  %v5075_v35 = vcombine.high %v604_v62, %v608_v63  ;;  %v644_v22 = vld [vmem:[#allocation7 + $0xd80] sm:$0xff] }
 0x13e   :  { %3585 = vmatpush1.bf16.msra.mxu1 %v4988_v49  ;;  %3422 = vmatprep.subr.bf16.mxu0 %v4995_v53  ;;  %v5036_v49 = vcombine.low %v565_v36, %v569_v37  ;;  %v5043_v53 = vcombine.high %v572_v43, %v576_v44  ;;  %v612_v36 = vld [vmem:[#allocation7 + $0xc80] sm:$0xff]  ;;  %v5804_v37 = vpack.c.bf16 %v203_v60, %v203_v60 }
 0x13f   :  { %3586 = vmatprep.subr.bf16.mxu1 %v4997_v50  ;;  %v5045_v50 = vcombine.high %v573_v45, %v577_v46  ;;  %v648_v24 = vld [vmem:[#allocation7 + $0xda0] sm:$0xff] }
 0x141   :  { %3423 = vmatpush1.bf16.msra.mxu0 %v4994_v57  ;;  %v5042_v57 = vcombine.low %v572_v43, %v576_v44 }
 0x142   :  { %3587 = vmatpush1.bf16.msra.mxu1 %v4996_v58  ;;  %3424 = vmatprep.subr.bf16.mxu0 %v5003_v61  ;;  %v5044_v58 = vcombine.low %v573_v45, %v577_v46  ;;  %v5051_v61 = vcombine.high %v580_v54, %v584_v55  ;;  %v620_v45 = vld [vmem:[#allocation7 + $0xcc0] sm:$0xff] }
 0x143   :  { %3588 = vmatprep.subr.bf16.mxu1 %v5005_v1  ;;  %v5053_v1 = vcombine.high %v581_v51, %v585_v56  ;;  %v624_v46 = vld [vmem:[#allocation7 + $0xce0] sm:$0xff] }
 0x145   :  { %3425 = vmatpush1.bf16.msra.mxu0 %v5002_v11  ;;  %v5050_v11 = vcombine.low %v580_v54, %v584_v55  ;;  %v5091_v54 = vcombine.high %v620_v45, %v624_v46 }
 0x146   :  { %3589 = vmatpush1.bf16.msra.mxu1 %v5004_v12  ;;  %3426 = vmatprep.subr.bf16.mxu0 %v5011_v13  ;;  %v5052_v12 = vcombine.low %v581_v51, %v585_v56  ;;  %v5059_v13 = vcombine.high %v588_v3, %v592_v4  ;;  %v628_v51 = vld [vmem:[#allocation7 + $0xd00] sm:$0xff] }
 0x147   :  { %3590 = vmatprep.subr.bf16.mxu1 %v5013_v14  ;;  %v5061_v14 = vcombine.high %v589_v7, %v593_v8  ;;  %v632_v56 = vld [vmem:[#allocation7 + $0xd20] sm:$0xff] }
 0x149   :  { %3427 = vmatpush1.bf16.msra.mxu0 %v5010_v28  ;;  %v5058_v28 = vcombine.low %v588_v3, %v592_v4  ;;  %v5099_v3 = vcombine.high %v628_v51, %v632_v56 }
 0x14a   :  { %3591 = vmatpush1.bf16.msra.mxu1 %v5012_v29  ;;  %3428 = vmatprep.subr.bf16.mxu0 %v5019_v30  ;;  %v5060_v29 = vcombine.low %v589_v7, %v593_v8  ;;  %v200_v30 = vmax.f32 %v5769_v9, 0.0  ;;  %v616_v9 = vld [vmem:[#allocation7 + $0xca0] sm:$0xff] }
 0x14b   :  { %3592 = vmatprep.subr.bf16.mxu1 %v5021_v31  ;;  %v5067_v31 = vcombine.high %v596_v15, %v600_v16  ;;  %v5083_v43 = vcombine.high %v612_v36, %v616_v9  ;;  %v636_v7 = vld [vmem:[#allocation7 + $0xd40] sm:$0xff] }
 0x14c   :  { %v640_v8 = vld [vmem:[#allocation7 + $0xd60] sm:$0xff] }
 0x14d   :  { %3429 = vmatpush1.bf16.msra.mxu0 %v5018_v0  ;;  %v5066_v0 = vcombine.low %v596_v15, %v600_v16  ;;  %v5107_v15 = vcombine.high %v636_v7, %v640_v8 }
 0x14e   :  { %3593 = vmatpush1.bf16.msra.mxu1 %v5020_v2  ;;  %3430 = vmatprep.subr.bf16.mxu0 %v5027_v32  ;;  %v605_v2 = vld [vmem:[#allocation7 + $0xc48] sm:$0xff] }
 0x14f   :  { %3594 = vmatprep.subr.bf16.mxu1 %v5029_v33  ;;  %v609_v32 = vld [vmem:[#allocation7 + $0xc68] sm:$0xff]  ;;  %v5801_v33 = vpack.c.bf16 %v200_v30, %v200_v30  ;;  %v5106_v30 = vcombine.low %v636_v7, %v640_v8  ;;  %v684_v7 = vld [vmem:[#allocation7 + $0xec0] sm:$0xff] }
 0x150   :  { %v5077_v10 = vcombine.high %v605_v2, %v609_v32  ;;  %v688_v8 = vld [vmem:[#allocation7 + $0xee0] sm:$0xff] }
 0x151   :  { %3431 = vmatpush1.bf16.msra.mxu0 %v5026_v38  ;;  %v613_v38 = vld [vmem:[#allocation7 + $0xc88] sm:$0xff] }
 0x152   :  { %3595 = vmatpush1.bf16.msra.mxu1 %v5028_v39  ;;  %3432 = vmatprep.subr.bf16.mxu0 %v5035_v41  ;;  %v617_v39 = vld [vmem:[#allocation7 + $0xca8] sm:$0xff]  ;;  %v5074_v41 = vcombine.low %v604_v62, %v608_v63  ;;  %v652_v62 = vld [vmem:[#allocation7 + $0xdc0] sm:$0xff] }
 0x153   :  { %3596 = vmatprep.subr.bf16.mxu1 %v5037_v42  ;;  %v5076_v42 = vcombine.low %v605_v2, %v609_v32  ;;  %v5085_v44 = vcombine.high %v613_v38, %v617_v39  ;;  %v656_v63 = vld [vmem:[#allocation7 + $0xde0] sm:$0xff]  ;;  %v657_v2 = vld [vmem:[#allocation7 + $0xde8] sm:$0xff]  ;;  %v5114_v32 = vcombine.low %v644_v22, %v648_v24 }
 0x155   :  { %3433 = vmatpush1.bf16.msra.mxu0 %v5034_v47  ;;  %v621_v47 = vld [vmem:[#allocation7 + $0xcc8] sm:$0xff] }
 0x156   :  { %3597 = vmatpush1.bf16.msra.mxu1 %v5036_v49  ;;  %3434 = vmatprep.subr.bf16.mxu0 %v5043_v53  ;;  %v625_v49 = vld [vmem:[#allocation7 + $0xce8] sm:$0xff]  ;;  %v5082_v53 = vcombine.low %v612_v36, %v616_v9  ;;  %v660_v9 = vld [vmem:[#allocation7 + $0xe00] sm:$0xff] }
 0x157   :  { %3598 = vmatprep.subr.bf16.mxu1 %v5045_v50  ;;  %v5084_v50 = vcombine.low %v613_v38, %v617_v39  ;;  %v5093_v55 = vcombine.high %v621_v47, %v625_v49  ;;  %v661_v38 = vld [vmem:[#allocation7 + $0xe08] sm:$0xff] }
 0x158   :  { %v665_v39 = vld [vmem:[#allocation7 + $0xe28] sm:$0xff] }
 0x159   :  { %3435 = vmatpush1.bf16.msra.mxu0 %v5042_v57  ;;  %v629_v57 = vld [vmem:[#allocation7 + $0xd08] sm:$0xff] }
 0x15a   :  { %3599 = vmatpush1.bf16.msra.mxu1 %v5044_v58  ;;  %3436 = vmatprep.subr.bf16.mxu0 %v5051_v61  ;;  %v633_v58 = vld [vmem:[#allocation7 + $0xd28] sm:$0xff]  ;;  %v5090_v61 = vcombine.low %v620_v45, %v624_v46  ;;  %v668_v45 = vld [vmem:[#allocation7 + $0xe40] sm:$0xff] }
 0x15b   :  { %3600 = vmatprep.subr.bf16.mxu1 %v5053_v1  ;;  %v5092_v1 = vcombine.low %v621_v47, %v625_v49  ;;  %v5101_v4 = vcombine.high %v629_v57, %v633_v58  ;;  %v672_v46 = vld [vmem:[#allocation7 + $0xe60] sm:$0xff]  ;;  %v669_v47 = vld [vmem:[#allocation7 + $0xe48] sm:$0xff] }
 0x15c   :  { %v673_v49 = vld [vmem:[#allocation7 + $0xe68] sm:$0xff] }
 0x15d   :  { %3437 = vmatpush1.bf16.msra.mxu0 %v5050_v11  ;;  %v637_v11 = vld [vmem:[#allocation7 + $0xd48] sm:$0xff] }
 0x15e   :  { %3601 = vmatpush1.bf16.msra.mxu1 %v5052_v12  ;;  %3438 = vmatprep.subr.bf16.mxu0 %v5059_v13  ;;  %v641_v12 = vld [vmem:[#allocation7 + $0xd68] sm:$0xff]  ;;  %v5098_v13 = vcombine.low %v628_v51, %v632_v56  ;;  %v676_v51 = vld [vmem:[#allocation7 + $0xe80] sm:$0xff] }
 0x15f   :  { %3602 = vmatprep.subr.bf16.mxu1 %v5061_v14  ;;  %v5100_v14 = vcombine.low %v629_v57, %v633_v58  ;;  %v5109_v16 = vcombine.high %v637_v11, %v641_v12  ;;  %v680_v56 = vld [vmem:[#allocation7 + $0xea0] sm:$0xff]  ;;  %v677_v57 = vld [vmem:[#allocation7 + $0xe88] sm:$0xff] }
 0x160   :  { %v681_v58 = vld [vmem:[#allocation7 + $0xea8] sm:$0xff] }
 0x161   :  { %3439 = vmatpush1.bf16.msra.mxu0 %v5058_v28  ;;  %v645_v28 = vld [vmem:[#allocation7 + $0xd88] sm:$0xff] }
 0x162   :  { %3603 = vmatpush1.bf16.msra.mxu1 %v5060_v29  ;;  %3449 = vmatprep.subr.bf16.mxu0 %v5067_v31  ;;  %v649_v29 = vld [vmem:[#allocation7 + $0xda8] sm:$0xff]  ;;  %v5108_v31 = vcombine.low %v637_v11, %v641_v12 }
 0x163   :  { %3613 = vmatprep.subr.bf16.mxu1 %v5069_v59  ;;  %v5115_v59 = vcombine.high %v644_v22, %v648_v24  ;;  %v5117_v60 = vcombine.high %v645_v28, %v649_v29  ;;  %v685_v11 = vld [vmem:[#allocation7 + $0xec8] sm:$0xff]  ;;  %v692_v22 = vld [vmem:[#allocation7 + $0xf00] sm:$0xff] }
 0x164   :  { %3441 = vmatmul.mubr.bf16.vlgmr.msra.gmra.mrb[0].mxu0 %v5801_v33  ;;  %v689_v12 = vld [vmem:[#allocation7 + $0xee8] sm:$0xff]  ;;  %v696_v24 = vld [vmem:[#allocation7 + $0xf20] sm:$0xff] }
 0x165   :  { %3605 = vmatmul.mubr.bf16.vlgmr.msra.gmra.mrb[0].mxu1 %v5801_v33  ;;  %3450 = vmatpush1.bf16.msra.mxu0 %v5066_v0  ;;  %v653_v0 = vld [vmem:[#allocation7 + $0xdc8] sm:$0xff] }
 0x166   :  { %3481 = vmatprep.mubr.bf16.mxu0 %v5804_v37  ;;  %3614 = vmatpush1.bf16.msra.mxu1 %v5068_v34  ;;  %v5116_v34 = vcombine.low %v645_v28, %v649_v29  ;;  %v5125_v36 = vcombine.high %v653_v0, %v657_v2  ;;  %v693_v28 = vld [vmem:[#allocation7 + $0xf08] sm:$0xff] }
 0x167   :  { %3645 = vmatprep.mubr.bf16.mxu1 %v5804_v37  ;;  %3451 = vmatprep.subr.bf16.mxu0 %v5075_v35  ;;  %v5123_v35 = vcombine.high %v652_v62, %v656_v63  ;;  %v697_v29 = vld [vmem:[#allocation7 + $0xf28] sm:$0xff] }
 0x168   :  { %3615 = vmatprep.subr.bf16.mxu1 %v5077_v10  ;;  %v664_v10 = vld [vmem:[#allocation7 + $0xe20] sm:$0xff] }
 0x169   :  { %3452 = vmatpush1.bf16.msra.mxu0 %v5074_v41  ;;  %v5122_v41 = vcombine.low %v652_v62, %v656_v63  ;;  %v700_v62 = vld [vmem:[#allocation7 + $0xf40] sm:$0xff] }
 0x16a   :  { %3616 = vmatpush1.bf16.msra.mxu1 %v5076_v42  ;;  %3453 = vmatprep.subr.bf16.mxu0 %v5083_v43  ;;  %v5124_v42 = vcombine.low %v653_v0, %v657_v2  ;;  %v5131_v43 = vcombine.high %v660_v9, %v664_v10  ;;  %v704_v63 = vld [vmem:[#allocation7 + $0xf60] sm:$0xff]  ;;  %v701_v0 = vld [vmem:[#allocation7 + $0xf48] sm:$0xff] }
 0x16b   :  { %3617 = vmatprep.subr.bf16.mxu1 %v5085_v44  ;;  %v5133_v44 = vcombine.high %v661_v38, %v665_v39  ;;  %v705_v2 = vld [vmem:[#allocation7 + $0xf68] sm:$0xff] }
 0x16d   :  { %3454 = vmatpush1.bf16.msra.mxu0 %v5082_v53  ;;  %v5130_v53 = vcombine.low %v660_v9, %v664_v10  ;;  %v708_v9 = vld [vmem:[#allocation7 + $0xf80] sm:$0xff] }
 0x16e   :  { %3618 = vmatpush1.bf16.msra.mxu1 %v5084_v50  ;;  %3455 = vmatprep.subr.bf16.mxu0 %v5091_v54  ;;  %v5132_v50 = vcombine.low %v661_v38, %v665_v39  ;;  %v5139_v54 = vcombine.high %v668_v45, %v672_v46  ;;  %v712_v10 = vld [vmem:[#allocation7 + $0xfa0] sm:$0xff]  ;;  %v709_v38 = vld [vmem:[#allocation7 + $0xf88] sm:$0xff] }
 0x16f   :  { %3619 = vmatprep.subr.bf16.mxu1 %v5093_v55  ;;  %v5141_v55 = vcombine.high %v669_v47, %v673_v49  ;;  %v713_v39 = vld [vmem:[#allocation7 + $0xfa8] sm:$0xff] }
 0x171   :  { %3456 = vmatpush1.bf16.msra.mxu0 %v5090_v61  ;;  %v5138_v61 = vcombine.low %v668_v45, %v672_v46  ;;  %v716_v45 = vld [vmem:[#allocation7 + $0xfc0] sm:$0xff] }
 0x172   :  { %3620 = vmatpush1.bf16.msra.mxu1 %v5092_v1  ;;  %3457 = vmatprep.subr.bf16.mxu0 %v5099_v3  ;;  %v5140_v1 = vcombine.low %v669_v47, %v673_v49  ;;  %v5147_v3 = vcombine.high %v676_v51, %v680_v56  ;;  %v720_v46 = vld [vmem:[#allocation7 + $0xfe0] sm:$0xff]  ;;  %v717_v47 = vld [vmem:[#allocation7 + $0xfc8] sm:$0xff] }
 0x173   :  { %3621 = vmatprep.subr.bf16.mxu1 %v5101_v4  ;;  %v5149_v4 = vcombine.high %v677_v57, %v681_v58  ;;  %v721_v49 = vld [vmem:[#allocation7 + $0xfe8] sm:$0xff] }
 0x175   :  { %3458 = vmatpush1.bf16.msra.mxu0 %v5098_v13  ;;  %v5146_v13 = vcombine.low %v676_v51, %v680_v56  ;;  %v214_v51 = vld [vmem:[#allocation7 + $0x10] sm:$0xff] }
 0x176   :  { %3622 = vmatpush1.bf16.msra.mxu1 %v5100_v14  ;;  %3459 = vmatprep.subr.bf16.mxu0 %v5107_v15  ;;  %v5148_v14 = vcombine.low %v677_v57, %v681_v58  ;;  %v5155_v15 = vcombine.high %v684_v7, %v688_v8  ;;  %v218_v56 = vld [vmem:[#allocation7 + $0x30] sm:$0xff]  ;;  %v215_v57 = vld [vmem:[#allocation7 + $0x18] sm:$0xff] }
 0x177   :  { %3623 = vmatprep.subr.bf16.mxu1 %v5109_v16  ;;  %v5157_v16 = vcombine.high %v685_v11, %v689_v12  ;;  %v219_v58 = vld [vmem:[#allocation7 + $0x38] sm:$0xff] }
 0x179   :  { %3460 = vmatpush1.bf16.msra.mxu0 %v5106_v30  ;;  %v5154_v30 = vcombine.low %v684_v7, %v688_v8  ;;  %v4689_v7 = vcombine.high %v215_v57, %v219_v58  ;;  %v222_v8 = vld [vmem:[#allocation7 + $0x50] sm:$0xff] }
 0x17a   :  { %3624 = vmatpush1.bf16.msra.mxu1 %v5108_v31  ;;  %3461 = vmatprep.subr.bf16.mxu0 %v5115_v59  ;;  %v5156_v31 = vcombine.low %v685_v11, %v689_v12  ;;  %v5163_v59 = vcombine.high %v692_v22, %v696_v24  ;;  %v226_v11 = vld [vmem:[#allocation7 + $0x70] sm:$0xff]  ;;  %v4686_v12 = vcombine.low %v214_v51, %v218_v56 }
 0x17b   :  { %3625 = vmatprep.subr.bf16.mxu1 %v5117_v60  ;;  %v5165_v60 = vcombine.high %v693_v28, %v697_v29 }
 0x17d   :  { %3462 = vmatpush1.bf16.msra.mxu0 %v5114_v32  ;;  %v5162_v32 = vcombine.low %v692_v22, %v696_v24  ;;  %v4695_v22 = vcombine.high %v222_v8, %v226_v11  ;;  %v230_v24 = vld [vmem:[#allocation7 + $0x90] sm:$0xff] }
 0x17e   :  { %3626 = vmatpush1.bf16.msra.mxu1 %v5116_v34  ;;  %3463 = vmatprep.subr.bf16.mxu0 %v5123_v35  ;;  %v5164_v34 = vcombine.low %v693_v28, %v697_v29  ;;  %v5171_v35 = vcombine.high %v700_v62, %v704_v63  ;;  %v234_v28 = vld [vmem:[#allocation7 + $0xb0] sm:$0xff]  ;;  %v231_v29 = vld [vmem:[#allocation7 + $0x98] sm:$0xff] }
 0x17f   :  { %3627 = vmatprep.subr.bf16.mxu1 %v5125_v36  ;;  %v5173_v36 = vcombine.high %v701_v0, %v705_v2 }
 0x181   :  { %3464 = vmatpush1.bf16.msra.mxu0 %v5122_v41  ;;  %v5170_v41 = vcombine.low %v700_v62, %v704_v63  ;;  %v238_v63 = vld [vmem:[#allocation7 + $0xd0] sm:$0xff] }
 0x182   :  { %3628 = vmatpush1.bf16.msra.mxu1 %v5124_v42  ;;  %3465 = vmatprep.subr.bf16.mxu0 %v5131_v43  ;;  %v5172_v42 = vcombine.low %v701_v0, %v705_v2  ;;  %v5179_v43 = vcombine.high %v708_v9, %v712_v10  ;;  %v242_v0 = vld [vmem:[#allocation7 + $0xf0] sm:$0xff]  ;;  %v239_v2 = vld [vmem:[#allocation7 + $0xd8] sm:$0xff] }
 0x183   :  { %3629 = vmatprep.subr.bf16.mxu1 %v5133_v44  ;;  %v5181_v44 = vcombine.high %v709_v38, %v713_v39 }
 0x185   :  { %3466 = vmatpush1.bf16.msra.mxu0 %v5130_v53  ;;  %v5178_v53 = vcombine.low %v708_v9, %v712_v10  ;;  %v246_v10 = vld [vmem:[#allocation7 + $0x110] sm:$0xff] }
 0x186   :  { %3630 = vmatpush1.bf16.msra.mxu1 %v5132_v50  ;;  %3467 = vmatprep.subr.bf16.mxu0 %v5139_v54  ;;  %v5180_v50 = vcombine.low %v709_v38, %v713_v39  ;;  %v5187_v54 = vcombine.high %v716_v45, %v720_v46  ;;  %v250_v38 = vld [vmem:[#allocation7 + $0x130] sm:$0xff]  ;;  %v247_v39 = vld [vmem:[#allocation7 + $0x118] sm:$0xff] }
 0x187   :  { %3631 = vmatprep.subr.bf16.mxu1 %v5141_v55  ;;  %v5189_v55 = vcombine.high %v717_v47, %v721_v49 }
 0x189   :  { %3468 = vmatpush1.bf16.msra.mxu0 %v5138_v61  ;;  %v5186_v61 = vcombine.low %v716_v45, %v720_v46  ;;  %v254_v45 = vld [vmem:[#allocation7 + $0x150] sm:$0xff] }
 0x18a   :  { %3632 = vmatpush1.bf16.msra.mxu1 %v5140_v1  ;;  %3469 = vmatprep.subr.bf16.mxu0 %v5147_v3  ;;  %v5188_v1 = vcombine.low %v717_v47, %v721_v49  ;;  %v202_v3 = vmax.f32 %v5785_v27, 0.0  ;;  %v258_v46 = vld [vmem:[#allocation7 + $0x170] sm:$0xff]  ;;  %v255_v47 = vld [vmem:[#allocation7 + $0x158] sm:$0xff] }
 0x18b   :  { %3633 = vmatprep.subr.bf16.mxu1 %v5149_v4  ;;  %v4687_v4 = vcombine.high %v214_v51, %v218_v56  ;;  %v259_v49 = vld [vmem:[#allocation7 + $0x178] sm:$0xff]  ;;  %v262_v51 = vld [vmem:[#allocation7 + $0x190] sm:$0xff] }
 0x18c   :  { %v266_v56 = vld [vmem:[#allocation7 + $0x1b0] sm:$0xff] }
 0x18d   :  { %3470 = vmatpush1.bf16.msra.mxu0 %v5146_v13  ;;  %v223_v13 = vld [vmem:[#allocation7 + $0x58] sm:$0xff] }
 0x18e   :  { %3634 = vmatpush1.bf16.msra.mxu1 %v5148_v14  ;;  %3471 = vmatprep.subr.bf16.mxu0 %v5155_v15  ;;  %v227_v14 = vld [vmem:[#allocation7 + $0x78] sm:$0xff]  ;;  %v5810_v15 = vpack.c.bf16 %v202_v3, %v202_v3  ;;  %v4735_v3 = vcombine.high %v262_v51, %v266_v56 }
 0x18f   :  { %3635 = vmatprep.subr.bf16.mxu1 %v5157_v16  ;;  %v4688_v16 = vcombine.low %v215_v57, %v219_v58  ;;  %v4697_v27 = vcombine.high %v223_v13, %v227_v14  ;;  %v263_v57 = vld [vmem:[#allocation7 + $0x198] sm:$0xff] }
 0x190   :  { %v267_v58 = vld [vmem:[#allocation7 + $0x1b8] sm:$0xff] }
 0x191   :  { %3472 = vmatpush1.bf16.msra.mxu0 %v5154_v30  ;;  %v235_v30 = vld [vmem:[#allocation7 + $0xb8] sm:$0xff] }
 0x192   :  { %3636 = vmatpush1.bf16.msra.mxu1 %v5156_v31  ;;  %3473 = vmatprep.subr.bf16.mxu0 %v5163_v59  ;;  %v4694_v31 = vcombine.low %v222_v8, %v226_v11  ;;  %v4696_v59 = vcombine.low %v223_v13, %v227_v14  ;;  %v4705_v62 = vcombine.high %v231_v29, %v235_v30  ;;  %v274_v8 = vld [vmem:[#allocation7 + $0x1f0] sm:$0xff]  ;;  %v271_v11 = vld [vmem:[#allocation7 + $0x1d8] sm:$0xff] }
 0x193   :  { %3637 = vmatprep.subr.bf16.mxu1 %v5165_v60  ;;  %v4703_v60 = vcombine.high %v230_v24, %v234_v28  ;;  %v4734_v13 = vcombine.low %v262_v51, %v266_v56  ;;  %v4736_v14 = vcombine.low %v263_v57, %v267_v58  ;;  %v314_v51 = vld [vmem:[#allocation7 + $0x330] sm:$0xff]  ;;  %v311_v56 = vld [vmem:[#allocation7 + $0x318] sm:$0xff] }
 0x195   :  { %3474 = vmatpush1.bf16.msra.mxu0 %v5162_v32  ;;  %v243_v32 = vld [vmem:[#allocation7 + $0xf8] sm:$0xff] }
 0x196   :  { %3638 = vmatpush1.bf16.msra.mxu1 %v5164_v34  ;;  %3475 = vmatprep.subr.bf16.mxu0 %v5171_v35  ;;  %v4702_v34 = vcombine.low %v230_v24, %v234_v28  ;;  %v4704_v35 = vcombine.low %v231_v29, %v235_v30  ;;  %v4713_v9 = vcombine.high %v239_v2, %v243_v32  ;;  %v278_v24 = vld [vmem:[#allocation7 + $0x210] sm:$0xff]  ;;  %v283_v29 = vld [vmem:[#allocation7 + $0x238] sm:$0xff] }
 0x197   :  { %3639 = vmatprep.subr.bf16.mxu1 %v5173_v36  ;;  %v4711_v36 = vcombine.high %v238_v63, %v242_v0  ;;  %v282_v28 = vld [vmem:[#allocation7 + $0x230] sm:$0xff] }
 0x199   :  { %3476 = vmatpush1.bf16.msra.mxu0 %v5170_v41  ;;  %v251_v41 = vld [vmem:[#allocation7 + $0x138] sm:$0xff] }
 0x19a   :  { %3640 = vmatpush1.bf16.msra.mxu1 %v5172_v42  ;;  %3477 = vmatprep.subr.bf16.mxu0 %v5179_v43  ;;  %v4712_v42 = vcombine.low %v239_v2, %v243_v32  ;;  %v4719_v43 = vcombine.high %v246_v10, %v250_v38  ;;  %v291_v2 = vld [vmem:[#allocation7 + $0x278] sm:$0xff]  ;;  %v4750_v32 = vcombine.low %v278_v24, %v282_v28 }
 0x19b   :  { %3641 = vmatprep.subr.bf16.mxu1 %v5181_v44  ;;  %v4721_v44 = vcombine.high %v247_v39, %v251_v41 }
 0x19d   :  { %3478 = vmatpush1.bf16.msra.mxu0 %v5178_v53  ;;  %v4718_v53 = vcombine.low %v246_v10, %v250_v38  ;;  %v298_v10 = vld [vmem:[#allocation7 + $0x2b0] sm:$0xff]  ;;  %v295_v38 = vld [vmem:[#allocation7 + $0x298] sm:$0xff] }
 0x19e   :  { %3642 = vmatpush1.bf16.msra.mxu1 %v5180_v50  ;;  %3479 = vmatprep.subr.bf16.mxu0 %v5187_v54  ;;  %v4720_v50 = vcombine.low %v247_v39, %v251_v41  ;;  %v4727_v54 = vcombine.high %v254_v45, %v258_v46  ;;  %v299_v39 = vld [vmem:[#allocation7 + $0x2b8] sm:$0xff] }
 0x19f   :  { %3643 = vmatprep.subr.bf16.mxu1 %v5189_v55  ;;  %v4729_v55 = vcombine.high %v255_v47, %v259_v49 }
 0x1a1   :  { %3480 = vmatpush1.bf16.msra.mxu0 %v5186_v61  ;;  %v4726_v61 = vcombine.low %v254_v45, %v258_v46  ;;  %v306_v45 = vld [vmem:[#allocation7 + $0x2f0] sm:$0xff]  ;;  %v303_v46 = vld [vmem:[#allocation7 + $0x2d8] sm:$0xff] }
 0x1a2   :  { %3644 = vmatpush1.bf16.msra.mxu1 %v5188_v1  ;;  %3654 = vmatprep.subr.bf16.mxu0 %v4687_v4  ;;  %v4728_v1 = vcombine.low %v255_v47, %v259_v49  ;;  %v4737_v4 = vcombine.high %v263_v57, %v267_v58  ;;  %v307_v47 = vld [vmem:[#allocation7 + $0x2f8] sm:$0xff] }
 0x1a3   :  { %3818 = vmatprep.subr.bf16.mxu1 %v4689_v7  ;;  %v270_v7 = vld [vmem:[#allocation7 + $0x1d0] sm:$0xff]  ;;  %v315_v57 = vld [vmem:[#allocation7 + $0x338] sm:$0xff] }
 0x1a4   :  { %3482 = vmatmul.mubr.bf16.vlgmr.msra.gmra.mrb[0].mxu0 %v5810_v15  ;;  %v4742_v30 = vcombine.low %v270_v7, %v274_v8 }
 0x1a5   :  { %3646 = vmatmul.mubr.bf16.vlgmr.msra.gmra.mrb[0].mxu1 %v5810_v15  ;;  %3655 = vmatpush1.bf16.msra.mxu0 %v4686_v12  ;;  %v275_v12 = vld [vmem:[#allocation7 + $0x1f8] sm:$0xff] }
 0x1a6   :  { %3686 = vmatprep.mubr.bf16.mxu0 %v5764_v5  ;;  %3819 = vmatpush1.bf16.msra.mxu1 %v4688_v16  ;;  %v4743_v16 = vcombine.high %v270_v7, %v274_v8  ;;  %v322_v7 = vld [vmem:[#allocation7 + $0x370] sm:$0xff]  ;;  %v319_v8 = vld [vmem:[#allocation7 + $0x358] sm:$0xff] }
 0x1a7   :  { %3850 = vmatprep.mubr.bf16.mxu1 %v5764_v5  ;;  %3656 = vmatprep.subr.bf16.mxu0 %v4695_v22  ;;  %v4710_v5 = vcombine.low %v238_v63, %v242_v0  ;;  %v4745_v22 = vcombine.high %v271_v11, %v275_v12  ;;  %v290_v63 = vld [vmem:[#allocation7 + $0x270] sm:$0xff]  ;;  %v287_v0 = vld [vmem:[#allocation7 + $0x258] sm:$0xff] }
 0x1a8   :  { %3820 = vmatprep.subr.bf16.mxu1 %v4697_v27  ;;  %v279_v27 = vld [vmem:[#allocation7 + $0x218] sm:$0xff] }
 0x1a9   :  { %3657 = vmatpush1.bf16.msra.mxu0 %v4694_v31  ;;  %v4744_v31 = vcombine.low %v271_v11, %v275_v12  ;;  %v323_v11 = vld [vmem:[#allocation7 + $0x378] sm:$0xff] }
 0x1aa   :  { %3821 = vmatpush1.bf16.msra.mxu1 %v4696_v59  ;;  %3658 = vmatprep.subr.bf16.mxu0 %v4703_v60  ;;  %v4751_v59 = vcombine.high %v278_v24, %v282_v28  ;;  %v4753_v60 = vcombine.high %v279_v27, %v283_v29  ;;  %v330_v24 = vld [vmem:[#allocation7 + $0x3b0] sm:$0xff]  ;;  %v327_v28 = vld [vmem:[#allocation7 + $0x398] sm:$0xff] }
 0x1ab   :  { %3822 = vmatprep.subr.bf16.mxu1 %v4705_v62  ;;  %v286_v62 = vld [vmem:[#allocation7 + $0x250] sm:$0xff] }
 0x1ac   :  { %v4758_v41 = vcombine.low %v286_v62, %v290_v63 }
 0x1ad   :  { %3659 = vmatpush1.bf16.msra.mxu0 %v4702_v34  ;;  %v4752_v34 = vcombine.low %v279_v27, %v283_v29  ;;  %v331_v27 = vld [vmem:[#allocation7 + $0x3b8] sm:$0xff] }
 0x1ae   :  { %3823 = vmatpush1.bf16.msra.mxu1 %v4704_v35  ;;  %3660 = vmatprep.subr.bf16.mxu0 %v4711_v36  ;;  %v4759_v35 = vcombine.high %v286_v62, %v290_v63  ;;  %v4761_v36 = vcombine.high %v287_v0, %v291_v2  ;;  %v338_v62 = vld [vmem:[#allocation7 + $0x3f0] sm:$0xff]  ;;  %v335_v63 = vld [vmem:[#allocation7 + $0x3d8] sm:$0xff] }
 0x1af   :  { %3824 = vmatprep.subr.bf16.mxu1 %v4713_v9  ;;  %v294_v9 = vld [vmem:[#allocation7 + $0x290] sm:$0xff] }
 0x1b0   :  { %v4766_v49 = vcombine.low %v294_v9, %v298_v10 }
 0x1b1   :  { %3661 = vmatpush1.bf16.msra.mxu0 %v4710_v5  ;;  %v4760_v5 = vcombine.low %v287_v0, %v291_v2  ;;  %v339_v0 = vld [vmem:[#allocation7 + $0x3f8] sm:$0xff] }
 0x1b2   :  { %3825 = vmatpush1.bf16.msra.mxu1 %v4712_v42  ;;  %3662 = vmatprep.subr.bf16.mxu0 %v4719_v43  ;;  %v4767_v42 = vcombine.high %v294_v9, %v298_v10  ;;  %v4769_v43 = vcombine.high %v295_v38, %v299_v39  ;;  %v346_v9 = vld [vmem:[#allocation7 + $0x430] sm:$0xff]  ;;  %v343_v10 = vld [vmem:[#allocation7 + $0x418] sm:$0xff] }
 0x1b3   :  { %3826 = vmatprep.subr.bf16.mxu1 %v4721_v44  ;;  %v302_v44 = vld [vmem:[#allocation7 + $0x2d0] sm:$0xff] }
 0x1b4   :  { %v4774_v58 = vcombine.low %v302_v44, %v306_v45 }
 0x1b5   :  { %3663 = vmatpush1.bf16.msra.mxu0 %v4718_v53  ;;  %v4768_v53 = vcombine.low %v295_v38, %v299_v39  ;;  %v347_v38 = vld [vmem:[#allocation7 + $0x438] sm:$0xff] }
 0x1b6   :  { %3827 = vmatpush1.bf16.msra.mxu1 %v4720_v50  ;;  %3664 = vmatprep.subr.bf16.mxu0 %v4727_v54  ;;  %v4775_v50 = vcombine.high %v302_v44, %v306_v45  ;;  %v4777_v54 = vcombine.high %v303_v46, %v307_v47  ;;  %v354_v44 = vld [vmem:[#allocation7 + $0x470] sm:$0xff] }
 0x1b7   :  { %3828 = vmatprep.subr.bf16.mxu1 %v4729_v55  ;;  %v310_v55 = vld [vmem:[#allocation7 + $0x310] sm:$0xff] }
 0x1b8   :  { %v4782_v12 = vcombine.low %v310_v55, %v314_v51 }
 0x1b9   :  { %3665 = vmatpush1.bf16.msra.mxu0 %v4726_v61  ;;  %v4776_v61 = vcombine.low %v303_v46, %v307_v47  ;;  %v351_v46 = vld [vmem:[#allocation7 + $0x458] sm:$0xff] }
 0x1ba   :  { %3829 = vmatpush1.bf16.msra.mxu1 %v4728_v1  ;;  %3666 = vmatprep.subr.bf16.mxu0 %v4735_v3  ;;  %v4783_v1 = vcombine.high %v310_v55, %v314_v51  ;;  %v4785_v3 = vcombine.high %v311_v56, %v315_v57  ;;  %v355_v47 = vld [vmem:[#allocation7 + $0x478] sm:$0xff] }
 0x1bb   :  { %3830 = vmatprep.subr.bf16.mxu1 %v4737_v4  ;;  %v318_v4 = vld [vmem:[#allocation7 + $0x350] sm:$0xff]  ;;  %v4825_v55 = vcombine.high %v351_v46, %v355_v47  ;;  %v359_v51 = vld [vmem:[#allocation7 + $0x498] sm:$0xff] }
 0x1bc   :  { %v4790_v29 = vcombine.low %v318_v4, %v322_v7 }
 0x1bd   :  { %3667 = vmatpush1.bf16.msra.mxu0 %v4734_v13  ;;  %v4784_v13 = vcombine.low %v311_v56, %v315_v57  ;;  %v363_v56 = vld [vmem:[#allocation7 + $0x4b8] sm:$0xff] }
 0x1be   :  { %3831 = vmatpush1.bf16.msra.mxu1 %v4736_v14  ;;  %3668 = vmatprep.subr.bf16.mxu0 %v4743_v16  ;;  %v4791_v14 = vcombine.high %v318_v4, %v322_v7  ;;  %v4793_v16 = vcombine.high %v319_v8, %v323_v11  ;;  %v370_v4 = vld [vmem:[#allocation7 + $0x4f0] sm:$0xff]  ;;  %v367_v7 = vld [vmem:[#allocation7 + $0x4d8] sm:$0xff] }
 0x1bf   :  { %3832 = vmatprep.subr.bf16.mxu1 %v4745_v22  ;;  %v326_v22 = vld [vmem:[#allocation7 + $0x390] sm:$0xff] }
 0x1c0   :  { %v4798_v2 = vcombine.low %v326_v22, %v330_v24 }
 0x1c1   :  { %3669 = vmatpush1.bf16.msra.mxu0 %v4742_v30  ;;  %v4792_v30 = vcombine.low %v319_v8, %v323_v11  ;;  %v371_v8 = vld [vmem:[#allocation7 + $0x4f8] sm:$0xff] }
 0x1c2   :  { %3833 = vmatpush1.bf16.msra.mxu1 %v4744_v31  ;;  %3670 = vmatprep.subr.bf16.mxu0 %v4751_v59  ;;  %v4799_v31 = vcombine.high %v326_v22, %v330_v24  ;;  %v4801_v59 = vcombine.high %v327_v28, %v331_v27  ;;  %v375_v22 = vld [vmem:[#allocation7 + $0x518] sm:$0xff] }
 0x1c3   :  { %3834 = vmatprep.subr.bf16.mxu1 %v4753_v60  ;;  %v334_v60 = vld [vmem:[#allocation7 + $0x3d0] sm:$0xff]  ;;  %v379_v24 = vld [vmem:[#allocation7 + $0x538] sm:$0xff] }
 0x1c4   :  { %v4806_v39 = vcombine.low %v334_v60, %v338_v62 }
 0x1c5   :  { %3671 = vmatpush1.bf16.msra.mxu0 %v4750_v32  ;;  %v4800_v32 = vcombine.low %v327_v28, %v331_v27  ;;  %v4840_v28 = vcombine.low %v367_v7, %v371_v8 }
 0x1c6   :  { %3835 = vmatpush1.bf16.msra.mxu1 %v4752_v34  ;;  %3672 = vmatprep.subr.bf16.mxu0 %v4759_v35  ;;  %v4807_v34 = vcombine.high %v334_v60, %v338_v62  ;;  %v4809_v35 = vcombine.high %v335_v63, %v339_v0  ;;  %v387_v60 = vld [vmem:[#allocation7 + $0x578] sm:$0xff] }
 0x1c7   :  { %3836 = vmatprep.subr.bf16.mxu1 %v4761_v36  ;;  %v342_v36 = vld [vmem:[#allocation7 + $0x410] sm:$0xff] }
 0x1c8   :  { %v4814_v45 = vcombine.low %v342_v36, %v346_v9 }
 0x1c9   :  { %3673 = vmatpush1.bf16.msra.mxu0 %v4758_v41  ;;  %v4808_v41 = vcombine.low %v335_v63, %v339_v0  ;;  %v4848_v63 = vcombine.low %v375_v22, %v379_v24 }
 0x1ca   :  { %3837 = vmatpush1.bf16.msra.mxu1 %v4760_v5  ;;  %3674 = vmatprep.subr.bf16.mxu0 %v4767_v42  ;;  %v4815_v5 = vcombine.high %v342_v36, %v346_v9  ;;  %v4817_v42 = vcombine.high %v343_v10, %v347_v38  ;;  %v395_v36 = vld [vmem:[#allocation7 + $0x5b8] sm:$0xff] }
 0x1cb   :  { %3838 = vmatprep.subr.bf16.mxu1 %v4769_v43  ;;  %v350_v43 = vld [vmem:[#allocation7 + $0x450] sm:$0xff] }
 0x1cc   :  { %v4822_v57 = vcombine.low %v350_v43, %v354_v44 }
 0x1cd   :  { %3675 = vmatpush1.bf16.msra.mxu0 %v4766_v49  ;;  %v4816_v49 = vcombine.low %v343_v10, %v347_v38 }
 0x1ce   :  { %3839 = vmatpush1.bf16.msra.mxu1 %v4768_v53  ;;  %3676 = vmatprep.subr.bf16.mxu0 %v4775_v50  ;;  %v4823_v53 = vcombine.high %v350_v43, %v354_v44  ;;  %v358_v50 = vld [vmem:[#allocation7 + $0x490] sm:$0xff]  ;;  %v403_v43 = vld [vmem:[#allocation7 + $0x5f8] sm:$0xff] }
 0x1cf   :  { %3840 = vmatprep.subr.bf16.mxu1 %v4777_v54  ;;  %v362_v54 = vld [vmem:[#allocation7 + $0x4b0] sm:$0xff] }
 0x1d0   :  { %v4830_v11 = vcombine.low %v358_v50, %v362_v54 }
 0x1d1   :  { %3677 = vmatpush1.bf16.msra.mxu0 %v4774_v58  ;;  %v4824_v58 = vcombine.low %v351_v46, %v355_v47 }
 0x1d2   :  { %3841 = vmatpush1.bf16.msra.mxu1 %v4776_v61  ;;  %3678 = vmatprep.subr.bf16.mxu0 %v4783_v1  ;;  %v4831_v61 = vcombine.high %v358_v50, %v362_v54  ;;  %v4833_v1 = vcombine.high %v359_v51, %v363_v56  ;;  %v407_v50 = vld [vmem:[#allocation7 + $0x618] sm:$0xff] }
 0x1d3   :  { %3842 = vmatprep.subr.bf16.mxu1 %v4785_v3  ;;  %v366_v3 = vld [vmem:[#allocation7 + $0x4d0] sm:$0xff]  ;;  %v411_v54 = vld [vmem:[#allocation7 + $0x638] sm:$0xff] }
 0x1d5   :  { %3679 = vmatpush1.bf16.msra.mxu0 %v4782_v12  ;;  %v4839_v12 = vcombine.high %v366_v3, %v370_v4 }
 0x1d6   :  { %3843 = vmatpush1.bf16.msra.mxu1 %v4784_v13  ;;  %3680 = vmatprep.subr.bf16.mxu0 %v4791_v14  ;;  %v4841_v13 = vcombine.high %v367_v7, %v371_v8  ;;  %v374_v14 = vld [vmem:[#allocation7 + $0x510] sm:$0xff]  ;;  %v4880_v7 = vcombine.low %v407_v50, %v411_v54 }
 0x1d7   :  { %3844 = vmatprep.subr.bf16.mxu1 %v4793_v16  ;;  %v378_v16 = vld [vmem:[#allocation7 + $0x530] sm:$0xff] }
 0x1d8   :  { %v4847_v27 = vcombine.high %v374_v14, %v378_v16  ;;  %v4846_v62 = vcombine.low %v374_v14, %v378_v16  ;;  %v427_v14 = vld [vmem:[#allocation7 + $0x6b8] sm:$0xff] }
 0x1d9   :  { %3681 = vmatpush1.bf16.msra.mxu0 %v4790_v29  ;;  %v4849_v29 = vcombine.high %v375_v22, %v379_v24 }
 0x1da   :  { %3845 = vmatpush1.bf16.msra.mxu1 %v4792_v30  ;;  %3682 = vmatprep.subr.bf16.mxu0 %v4799_v31  ;;  %v382_v30 = vld [vmem:[#allocation7 + $0x550] sm:$0xff] }
 0x1db   :  { %3846 = vmatprep.subr.bf16.mxu1 %v4801_v59  ;;  %v386_v31 = vld [vmem:[#allocation7 + $0x570] sm:$0xff]  ;;  %v383_v59 = vld [vmem:[#allocation7 + $0x558] sm:$0xff] }
 0x1dc   :  { %v4855_v0 = vcombine.high %v382_v30, %v386_v31  ;;  %v4854_v9 = vcombine.low %v382_v30, %v386_v31  ;;  %v4856_v10 = vcombine.low %v383_v59, %v387_v60  ;;  %v435_v30 = vld [vmem:[#allocation7 + $0x6f8] sm:$0xff] }
 0x1dd   :  { %3683 = vmatpush1.bf16.msra.mxu0 %v4798_v2  ;;  %v4857_v2 = vcombine.high %v383_v59, %v387_v60 }
 0x1de   :  { %3847 = vmatpush1.bf16.msra.mxu1 %v4800_v32  ;;  %3684 = vmatprep.subr.bf16.mxu0 %v4807_v34  ;;  %v390_v32 = vld [vmem:[#allocation7 + $0x590] sm:$0xff] }
 0x1df   :  { %3848 = vmatprep.subr.bf16.mxu1 %v4809_v35  ;;  %v394_v34 = vld [vmem:[#allocation7 + $0x5b0] sm:$0xff]  ;;  %v391_v35 = vld [vmem:[#allocation7 + $0x598] sm:$0xff] }
 0x1e0   :  { %v4863_v38 = vcombine.high %v390_v32, %v394_v34  ;;  %v4862_v44 = vcombine.low %v390_v32, %v394_v34  ;;  %v443_v32 = vld [vmem:[#allocation7 + $0x738] sm:$0xff] }
 0x1e1   :  { %3685 = vmatpush1.bf16.msra.mxu0 %v4806_v39  ;;  %v4865_v39 = vcombine.high %v391_v35, %v395_v36 }
 0x1e2   :  { %3849 = vmatpush1.bf16.msra.mxu1 %v4808_v41  ;;  %3695 = vmatprep.subr.bf16.mxu0 %v4815_v5  ;;  %v398_v41 = vld [vmem:[#allocation7 + $0x5d0] sm:$0xff] }
 0x1e3   :  { %3859 = vmatprep.subr.bf16.mxu1 %v4817_v42  ;;  %v402_v5 = vld [vmem:[#allocation7 + $0x5f0] sm:$0xff]  ;;  %v399_v42 = vld [vmem:[#allocation7 + $0x5d8] sm:$0xff] }
 0x1e4   :  { %3687 = vmatmul.mubr.bf16.vlgmr.msra.gmra.mrb[4].mxu0 %v5766_v6  ;;  %v4871_v46 = vcombine.high %v398_v41, %v402_v5  ;;  %v4873_v47 = vcombine.high %v399_v42, %v403_v43 }
 0x1e5   :  { %3851 = vmatmul.mubr.bf16.vlgmr.msra.gmra.mrb[4].mxu1 %v5766_v6  ;;  %3696 = vmatpush1.bf16.msra.mxu0 %v4814_v45  ;;  %v4832_v6 = vcombine.low %v359_v51, %v363_v56  ;;  %v4864_v45 = vcombine.low %v391_v35, %v395_v36  ;;  %v4872_v51 = vcombine.low %v399_v42, %v403_v43 }
 0x1e6   :  { %3727 = vmatprep.mubr.bf16.mxu0 %v5777_v17  ;;  %3860 = vmatpush1.bf16.msra.mxu1 %v4816_v49  ;;  %v406_v49 = vld [vmem:[#allocation7 + $0x610] sm:$0xff] }
 0x1e7   :  { %3891 = vmatprep.mubr.bf16.mxu1 %v5777_v17  ;;  %3697 = vmatprep.subr.bf16.mxu0 %v4823_v53  ;;  %v4838_v17 = vcombine.low %v366_v3, %v370_v4  ;;  %v410_v53 = vld [vmem:[#allocation7 + $0x630] sm:$0xff]  ;;  %v419_v3 = vld [vmem:[#allocation7 + $0x678] sm:$0xff] }
 0x1e8   :  { %3861 = vmatprep.subr.bf16.mxu1 %v4825_v55  ;;  %v4870_v55 = vcombine.low %v398_v41, %v402_v5  ;;  %v4879_v56 = vcombine.high %v406_v49, %v410_v53  ;;  %v4878_v4 = vcombine.low %v406_v49, %v410_v53  ;;  %v451_v41 = vld [vmem:[#allocation7 + $0x778] sm:$0xff] }
 0x1e9   :  { %3698 = vmatpush1.bf16.msra.mxu0 %v4822_v57  ;;  %v4881_v57 = vcombine.high %v407_v50, %v411_v54  ;;  %v459_v49 = vld [vmem:[#allocation7 + $0x7b8] sm:$0xff] }
 0x1ea   :  { %3862 = vmatpush1.bf16.msra.mxu1 %v4824_v58  ;;  %3699 = vmatprep.subr.bf16.mxu0 %v4831_v61  ;;  %v414_v58 = vld [vmem:[#allocation7 + $0x650] sm:$0xff] }
 0x1eb   :  { %3863 = vmatprep.subr.bf16.mxu1 %v4833_v1  ;;  %v418_v61 = vld [vmem:[#allocation7 + $0x670] sm:$0xff]  ;;  %v415_v1 = vld [vmem:[#allocation7 + $0x658] sm:$0xff] }
 0x1ec   :  { %v4887_v8 = vcombine.high %v414_v58, %v418_v61  ;;  %v4886_v16 = vcombine.low %v414_v58, %v418_v61  ;;  %v4888_v22 = vcombine.low %v415_v1, %v419_v3  ;;  %v467_v58 = vld [vmem:[#allocation7 + $0x7f8] sm:$0xff] }
 0x1ed   :  { %3700 = vmatpush1.bf16.msra.mxu0 %v4830_v11  ;;  %v4889_v11 = vcombine.high %v415_v1, %v419_v3 }
 0x1ee   :  { %3864 = vmatpush1.bf16.msra.mxu1 %v4832_v6  ;;  %3701 = vmatprep.subr.bf16.mxu0 %v4839_v12  ;;  %v422_v6 = vld [vmem:[#allocation7 + $0x690] sm:$0xff] }
 0x1ef   :  { %3865 = vmatprep.subr.bf16.mxu1 %v4841_v13  ;;  %v426_v12 = vld [vmem:[#allocation7 + $0x6b0] sm:$0xff]  ;;  %v423_v13 = vld [vmem:[#allocation7 + $0x698] sm:$0xff] }
 0x1f0   :  { %v4895_v24 = vcombine.high %v422_v6, %v426_v12  ;;  %v4894_v31 = vcombine.low %v422_v6, %v426_v12  ;;  %v4896_v59 = vcombine.low %v423_v13, %v427_v14  ;;  %v475_v6 = vld [vmem:[#allocation7 + $0x838] sm:$0xff] }
 0x1f1   :  { %3702 = vmatpush1.bf16.msra.mxu0 %v4838_v17  ;;  %v4897_v17 = vcombine.high %v423_v13, %v427_v14 }
 0x1f2   :  { %3866 = vmatpush1.bf16.msra.mxu1 %v4840_v28  ;;  %3703 = vmatprep.subr.bf16.mxu0 %v4847_v27  ;;  %v430_v28 = vld [vmem:[#allocation7 + $0x6d0] sm:$0xff] }
 0x1f3   :  { %3867 = vmatprep.subr.bf16.mxu1 %v4849_v29  ;;  %v434_v27 = vld [vmem:[#allocation7 + $0x6f0] sm:$0xff]  ;;  %v431_v29 = vld [vmem:[#allocation7 + $0x6d8] sm:$0xff] }
 0x1f4   :  { %v4903_v60 = vcombine.high %v430_v28, %v434_v27  ;;  %v4902_v34 = vcombine.low %v430_v28, %v434_v27  ;;  %v4904_v35 = vcombine.low %v431_v29, %v435_v30  ;;  %v479_v28 = vld [vmem:[#allocation7 + $0x858] sm:$0xff] }
 0x1f5   :  { %3704 = vmatpush1.bf16.msra.mxu0 %v4846_v62  ;;  %v4905_v62 = vcombine.high %v431_v29, %v435_v30  ;;  %v483_v27 = vld [vmem:[#allocation7 + $0x878] sm:$0xff] }
 0x1f6   :  { %3868 = vmatpush1.bf16.msra.mxu1 %v4848_v63  ;;  %3705 = vmatprep.subr.bf16.mxu0 %v4855_v0  ;;  %v438_v63 = vld [vmem:[#allocation7 + $0x710] sm:$0xff] }
 0x1f7   :  { %3869 = vmatprep.subr.bf16.mxu1 %v4857_v2  ;;  %v442_v0 = vld [vmem:[#allocation7 + $0x730] sm:$0xff]  ;;  %v439_v2 = vld [vmem:[#allocation7 + $0x718] sm:$0xff] }
 0x1f8   :  { %v4911_v36 = vcombine.high %v438_v63, %v442_v0  ;;  %v4910_v5 = vcombine.low %v438_v63, %v442_v0  ;;  %v4912_v42 = vcombine.low %v439_v2, %v443_v32  ;;  %v491_v63 = vld [vmem:[#allocation7 + $0x8b8] sm:$0xff] }
 0x1f9   :  { %3706 = vmatpush1.bf16.msra.mxu0 %v4854_v9  ;;  %v4913_v9 = vcombine.high %v439_v2, %v443_v32  ;;  %v4952_v2 = vcombine.low %v479_v28, %v483_v27 }
 0x1fa   :  { %3870 = vmatpush1.bf16.msra.mxu1 %v4856_v10  ;;  %3707 = vmatprep.subr.bf16.mxu0 %v4863_v38  ;;  %v446_v10 = vld [vmem:[#allocation7 + $0x750] sm:$0xff] }
 0x1fb   :  { %3871 = vmatprep.subr.bf16.mxu1 %v4865_v39  ;;  %v450_v38 = vld [vmem:[#allocation7 + $0x770] sm:$0xff]  ;;  %v447_v39 = vld [vmem:[#allocation7 + $0x758] sm:$0xff] }
 0x1fc   :  { %v4919_v43 = vcombine.high %v446_v10, %v450_v38  ;;  %v4918_v53 = vcombine.low %v446_v10, %v450_v38  ;;  %v4920_v50 = vcombine.low %v447_v39, %v451_v41  ;;  %v499_v10 = vld [vmem:[#allocation7 + $0x8f8] sm:$0xff] }
 0x1fd   :  { %3708 = vmatpush1.bf16.msra.mxu0 %v4862_v44  ;;  %v4921_v44 = vcombine.high %v447_v39, %v451_v41 }
 0x1fe   :  { %3872 = vmatpush1.bf16.msra.mxu1 %v4864_v45  ;;  %3709 = vmatprep.subr.bf16.mxu0 %v4871_v46  ;;  %v454_v45 = vld [vmem:[#allocation7 + $0x790] sm:$0xff] }
 0x1ff   :  { %3873 = vmatprep.subr.bf16.mxu1 %v4873_v47  ;;  %v458_v46 = vld [vmem:[#allocation7 + $0x7b0] sm:$0xff]  ;;  %v455_v47 = vld [vmem:[#allocation7 + $0x798] sm:$0xff] }
 0x200   :  { %v4927_v54 = vcombine.high %v454_v45, %v458_v46  ;;  %v4926_v61 = vcombine.low %v454_v45, %v458_v46  ;;  %v4928_v1 = vcombine.low %v455_v47, %v459_v49 }
 0x201   :  { %3710 = vmatpush1.bf16.msra.mxu0 %v4870_v55  ;;  %v4929_v55 = vcombine.high %v455_v47, %v459_v49  ;;  %v510_v49 = vld [vmem:[#allocation7 + $0x950] sm:$0xff] }
 0x202   :  { %3874 = vmatpush1.bf16.msra.mxu1 %v4872_v51  ;;  %3711 = vmatprep.subr.bf16.mxu0 %v4879_v56  ;;  %v462_v51 = vld [vmem:[#allocation7 + $0x7d0] sm:$0xff] }
 0x203   :  { %3875 = vmatprep.subr.bf16.mxu1 %v4881_v57  ;;  %v466_v56 = vld [vmem:[#allocation7 + $0x7f0] sm:$0xff]  ;;  %v463_v57 = vld [vmem:[#allocation7 + $0x7d8] sm:$0xff] }
 0x204   :  { %v4935_v3 = vcombine.high %v462_v51, %v466_v56  ;;  %v4934_v12 = vcombine.low %v462_v51, %v466_v56  ;;  %v4936_v13 = vcombine.low %v463_v57, %v467_v58 }
 0x205   :  { %3712 = vmatpush1.bf16.msra.mxu0 %v4878_v4  ;;  %v4937_v4 = vcombine.high %v463_v57, %v467_v58  ;;  %v518_v58 = vld [vmem:[#allocation7 + $0x990] sm:$0xff] }
 0x206   :  { %3876 = vmatpush1.bf16.msra.mxu1 %v4880_v7  ;;  %3713 = vmatprep.subr.bf16.mxu0 %v4887_v8  ;;  %v470_v7 = vld [vmem:[#allocation7 + $0x810] sm:$0xff] }
 0x207   :  { %3877 = vmatprep.subr.bf16.mxu1 %v4889_v11  ;;  %v474_v8 = vld [vmem:[#allocation7 + $0x830] sm:$0xff]  ;;  %v471_v11 = vld [vmem:[#allocation7 + $0x818] sm:$0xff] }
 0x208   :  { %v4943_v14 = vcombine.high %v470_v7, %v474_v8  ;;  %v4944_v29 = vcombine.low %v471_v11, %v475_v6 }
 0x209   :  { %3714 = vmatpush1.bf16.msra.mxu0 %v4886_v16  ;;  %v4945_v16 = vcombine.high %v471_v11, %v475_v6  ;;  %v526_v6 = vld [vmem:[#allocation7 + $0x9d0] sm:$0xff] }
 0x20a   :  { %3878 = vmatpush1.bf16.msra.mxu1 %v4888_v22  ;;  %3715 = vmatprep.subr.bf16.mxu0 %v4895_v24  ;;  %v478_v22 = vld [vmem:[#allocation7 + $0x850] sm:$0xff] }
 0x20b   :  { %3879 = vmatprep.subr.bf16.mxu1 %v4897_v17  ;;  %v482_v24 = vld [vmem:[#allocation7 + $0x870] sm:$0xff]  ;;  %v4942_v17 = vcombine.low %v470_v7, %v474_v8 }
 0x20c   :  { %v4951_v30 = vcombine.high %v478_v22, %v482_v24  ;;  %v4950_v0 = vcombine.low %v478_v22, %v482_v24 }
 0x20d   :  { %3716 = vmatpush1.bf16.msra.mxu0 %v4894_v31  ;;  %v486_v31 = vld [vmem:[#allocation7 + $0x890] sm:$0xff] }
 0x20e   :  { %3880 = vmatpush1.bf16.msra.mxu1 %v4896_v59  ;;  %3717 = vmatprep.subr.bf16.mxu0 %v4903_v60  ;;  %v490_v59 = vld [vmem:[#allocation7 + $0x8b0] sm:$0xff]  ;;  %v4953_v60 = vcombine.high %v479_v28, %v483_v27 }
 0x20f   :  { %3881 = vmatprep.subr.bf16.mxu1 %v4905_v62  ;;  %v487_v62 = vld [vmem:[#allocation7 + $0x898] sm:$0xff]  ;;  %v4959_v32 = vcombine.high %v486_v31, %v490_v59  ;;  %v4958_v38 = vcombine.low %v486_v31, %v490_v59  ;;  %v534_v28 = vld [vmem:[#allocation7 + $0xa10] sm:$0xff] }
 0x210   :  { %v538_v27 = vld [vmem:[#allocation7 + $0xa30] sm:$0xff] }
 0x211   :  { %3718 = vmatpush1.bf16.msra.mxu0 %v4902_v34  ;;  %v4961_v34 = vcombine.high %v487_v62, %v491_v63 }
 0x212   :  { %3882 = vmatpush1.bf16.msra.mxu1 %v4904_v35  ;;  %3719 = vmatprep.subr.bf16.mxu0 %v4911_v36  ;;  %v494_v35 = vld [vmem:[#allocation7 + $0x8d0] sm:$0xff] }
 0x213   :  { %3883 = vmatprep.subr.bf16.mxu1 %v4913_v9  ;;  %v498_v36 = vld [vmem:[#allocation7 + $0x8f0] sm:$0xff]  ;;  %v495_v9 = vld [vmem:[#allocation7 + $0x8d8] sm:$0xff] }
 0x214   :  { %v4967_v39 = vcombine.high %v494_v35, %v498_v36  ;;  %v4969_v41 = vcombine.high %v495_v9, %v499_v10  ;;  %v4968_v45 = vcombine.low %v495_v9, %v499_v10  ;;  %v550_v10 = vld [vmem:[#allocation7 + $0xa90] sm:$0xff] }
 0x215   :  { %3720 = vmatpush1.bf16.msra.mxu0 %v4910_v5  ;;  %v502_v5 = vld [vmem:[#allocation7 + $0x910] sm:$0xff] }
 0x216   :  { %3884 = vmatpush1.bf16.msra.mxu1 %v4912_v42  ;;  %3721 = vmatprep.subr.bf16.mxu0 %v4919_v43  ;;  %v506_v42 = vld [vmem:[#allocation7 + $0x930] sm:$0xff]  ;;  %v503_v43 = vld [vmem:[#allocation7 + $0x918] sm:$0xff] }
 0x217   :  { %3885 = vmatprep.subr.bf16.mxu1 %v4921_v44  ;;  %v507_v44 = vld [vmem:[#allocation7 + $0x938] sm:$0xff]  ;;  %v4975_v46 = vcombine.high %v502_v5, %v506_v42 }
 0x218   :  { %v4977_v47 = vcombine.high %v503_v43, %v507_v44  ;;  %v4976_v51 = vcombine.low %v503_v43, %v507_v44  ;;  %v558_v44 = vld [vmem:[#allocation7 + $0xad0] sm:$0xff] }
 0x219   :  { %3722 = vmatpush1.bf16.msra.mxu0 %v4918_v53  ;;  %v514_v53 = vld [vmem:[#allocation7 + $0x970] sm:$0xff] }
 0x21a   :  { %3886 = vmatpush1.bf16.msra.mxu1 %v4920_v50  ;;  %3723 = vmatprep.subr.bf16.mxu0 %v4927_v54  ;;  %v511_v50 = vld [vmem:[#allocation7 + $0x958] sm:$0xff]  ;;  %v4983_v56 = vcombine.high %v510_v49, %v514_v53 }
 0x21b   :  { %3887 = vmatprep.subr.bf16.mxu1 %v4929_v55  ;;  %v515_v54 = vld [vmem:[#allocation7 + $0x978] sm:$0xff]  ;;  %v4974_v55 = vcombine.low %v502_v5, %v506_v42 }
 0x21c   :  { %v4985_v57 = vcombine.high %v511_v50, %v515_v54  ;;  %v4984_v7 = vcombine.low %v511_v50, %v515_v54  ;;  %v566_v54 = vld [vmem:[#allocation7 + $0xb10] sm:$0xff] }
 0x21d   :  { %3724 = vmatpush1.bf16.msra.mxu0 %v4926_v61  ;;  %v522_v61 = vld [vmem:[#allocation7 + $0x9b0] sm:$0xff] }
 0x21e   :  { %3888 = vmatpush1.bf16.msra.mxu1 %v4928_v1  ;;  %3725 = vmatprep.subr.bf16.mxu0 %v4935_v3  ;;  %v519_v1 = vld [vmem:[#allocation7 + $0x998] sm:$0xff]  ;;  %v4991_v8 = vcombine.high %v518_v58, %v522_v61 }
 0x21f   :  { %3889 = vmatprep.subr.bf16.mxu1 %v4937_v4  ;;  %v523_v3 = vld [vmem:[#allocation7 + $0x9b8] sm:$0xff]  ;;  %v4982_v4 = vcombine.low %v510_v49, %v514_v53 }
 0x220   :  { %v4993_v11 = vcombine.high %v519_v1, %v523_v3  ;;  %v4992_v22 = vcombine.low %v519_v1, %v523_v3  ;;  %v574_v3 = vld [vmem:[#allocation7 + $0xb50] sm:$0xff] }
 0x221   :  { %3726 = vmatpush1.bf16.msra.mxu0 %v4934_v12  ;;  %v530_v12 = vld [vmem:[#allocation7 + $0x9f0] sm:$0xff] }
 0x222   :  { %3890 = vmatpush1.bf16.msra.mxu1 %v4936_v13  ;;  %3736 = vmatprep.subr.bf16.mxu0 %v4943_v14  ;;  %v527_v13 = vld [vmem:[#allocation7 + $0x9d8] sm:$0xff]  ;;  %v4999_v24 = vcombine.high %v526_v6, %v530_v12  ;;  %v4998_v31 = vcombine.low %v526_v6, %v530_v12 }
 0x223   :  { %3900 = vmatprep.subr.bf16.mxu1 %v4945_v16  ;;  %v531_v14 = vld [vmem:[#allocation7 + $0x9f8] sm:$0xff]  ;;  %v4990_v16 = vcombine.low %v518_v58, %v522_v61 }
 0x224   :  { %3728 = vmatmul.mubr.bf16.vlgmr.msra.gmra.mrb[4].mxu0 %v5791_v48  ;;  %v5000_v59 = vcombine.low %v527_v13, %v531_v14 }
 0x225   :  { %3892 = vmatmul.mubr.bf16.vlgmr.msra.gmra.mrb[4].mxu1 %v5791_v48  ;;  %3737 = vmatpush1.bf16.msra.mxu0 %v4942_v17  ;;  %v4960_v48 = vcombine.low %v487_v62, %v491_v63  ;;  %v5001_v17 = vcombine.high %v527_v13, %v531_v14  ;;  %v542_v63 = vld [vmem:[#allocation7 + $0xa50] sm:$0xff] }
 0x226   :  { %3768 = vmatprep.mubr.bf16.mxu0 %v5793_v52  ;;  %3901 = vmatpush1.bf16.msra.mxu1 %v4944_v29  ;;  %v535_v29 = vld [vmem:[#allocation7 + $0xa18] sm:$0xff]  ;;  %v582_v14 = vld [vmem:[#allocation7 + $0xb90] sm:$0xff] }
 0x227   :  { %3932 = vmatprep.mubr.bf16.mxu1 %v5793_v52  ;;  %3738 = vmatprep.subr.bf16.mxu0 %v4951_v30  ;;  %v4966_v52 = vcombine.low %v494_v35, %v498_v36  ;;  %v539_v30 = vld [vmem:[#allocation7 + $0xa38] sm:$0xff] }
 0x228   :  { %3902 = vmatprep.subr.bf16.mxu1 %v4953_v60  ;;  %v5007_v60 = vcombine.high %v534_v28, %v538_v27  ;;  %v5009_v62 = vcombine.high %v535_v29, %v539_v30  ;;  %v5008_v35 = vcombine.low %v535_v29, %v539_v30  ;;  %v590_v30 = vld [vmem:[#allocation7 + $0xbd0] sm:$0xff] }
 0x229   :  { %3739 = vmatpush1.bf16.msra.mxu0 %v4950_v0  ;;  %v546_v0 = vld [vmem:[#allocation7 + $0xa70] sm:$0xff] }
 0x22a   :  { %3903 = vmatpush1.bf16.msra.mxu1 %v4952_v2  ;;  %3740 = vmatprep.subr.bf16.mxu0 %v4959_v32  ;;  %v543_v2 = vld [vmem:[#allocation7 + $0xa58] sm:$0xff]  ;;  %v5015_v36 = vcombine.high %v542_v63, %v546_v0 }
 0x22b   :  { %3904 = vmatprep.subr.bf16.mxu1 %v4961_v34  ;;  %v547_v32 = vld [vmem:[#allocation7 + $0xa78] sm:$0xff]  ;;  %v5006_v34 = vcombine.low %v534_v28, %v538_v27 }
 0x22c   :  { %v5017_v9 = vcombine.high %v543_v2, %v547_v32  ;;  %v5016_v5 = vcombine.low %v543_v2, %v547_v32  ;;  %v598_v32 = vld [vmem:[#allocation7 + $0xc10] sm:$0xff] }
 0x22d   :  { %3741 = vmatpush1.bf16.msra.mxu0 %v4958_v38  ;;  %v554_v38 = vld [vmem:[#allocation7 + $0xab0] sm:$0xff] }
 0x22e   :  { %3905 = vmatpush1.bf16.msra.mxu1 %v4960_v48  ;;  %3742 = vmatprep.subr.bf16.mxu0 %v4967_v39  ;;  %v551_v48 = vld [vmem:[#allocation7 + $0xa98] sm:$0xff]  ;;  %v5023_v42 = vcombine.high %v550_v10, %v554_v38 }
 0x22f   :  { %3906 = vmatprep.subr.bf16.mxu1 %v4969_v41  ;;  %v555_v39 = vld [vmem:[#allocation7 + $0xab8] sm:$0xff]  ;;  %v5014_v41 = vcombine.low %v542_v63, %v546_v0 }
 0x230   :  { %v5025_v43 = vcombine.high %v551_v48, %v555_v39  ;;  %v5024_v49 = vcombine.low %v551_v48, %v555_v39  ;;  %v606_v39 = vld [vmem:[#allocation7 + $0xc50] sm:$0xff] }
 0x231   :  { %3743 = vmatpush1.bf16.msra.mxu0 %v4966_v52  ;;  %v562_v52 = vld [vmem:[#allocation7 + $0xaf0] sm:$0xff] }
 0x232   :  { %3907 = vmatpush1.bf16.msra.mxu1 %v4968_v45  ;;  %3744 = vmatprep.subr.bf16.mxu0 %v4975_v46  ;;  %v559_v45 = vld [vmem:[#allocation7 + $0xad8] sm:$0xff]  ;;  %v5031_v53 = vcombine.high %v558_v44, %v562_v52 }
 0x233   :  { %3908 = vmatprep.subr.bf16.mxu1 %v4977_v47  ;;  %v563_v46 = vld [vmem:[#allocation7 + $0xaf8] sm:$0xff]  ;;  %v5022_v47 = vcombine.low %v550_v10, %v554_v38 }
 0x234   :  { %v5033_v50 = vcombine.high %v559_v45, %v563_v46  ;;  %v5032_v58 = vcombine.low %v559_v45, %v563_v46  ;;  %v614_v45 = vld [vmem:[#allocation7 + $0xc90] sm:$0xff] }
 0x235   :  { %3745 = vmatpush1.bf16.msra.mxu0 %v4974_v55  ;;  %v570_v55 = vld [vmem:[#allocation7 + $0xb30] sm:$0xff] }
 0x236   :  { %3909 = vmatpush1.bf16.msra.mxu1 %v4976_v51  ;;  %3746 = vmatprep.subr.bf16.mxu0 %v4983_v56  ;;  %v567_v51 = vld [vmem:[#allocation7 + $0xb18] sm:$0xff]  ;;  %v5039_v61 = vcombine.high %v566_v54, %v570_v55  ;;  %v618_v46 = vld [vmem:[#allocation7 + $0xcb0] sm:$0xff] }
 0x237   :  { %3910 = vmatprep.subr.bf16.mxu1 %v4985_v57  ;;  %v571_v56 = vld [vmem:[#allocation7 + $0xb38] sm:$0xff]  ;;  %v5030_v57 = vcombine.low %v558_v44, %v562_v52 }
 0x238   :  { %v5041_v1 = vcombine.high %v567_v51, %v571_v56  ;;  %v5040_v6 = vcombine.low %v567_v51, %v571_v56  ;;  %v622_v56 = vld [vmem:[#allocation7 + $0xcd0] sm:$0xff] }
 0x239   :  { %3747 = vmatpush1.bf16.msra.mxu0 %v4982_v4  ;;  %v578_v4 = vld [vmem:[#allocation7 + $0xb70] sm:$0xff] }
 0x23a   :  { %3911 = vmatpush1.bf16.msra.mxu1 %v4984_v7  ;;  %3748 = vmatprep.subr.bf16.mxu0 %v4991_v8  ;;  %v575_v7 = vld [vmem:[#allocation7 + $0xb58] sm:$0xff]  ;;  %v5047_v12 = vcombine.high %v574_v3, %v578_v4 }
 0x23b   :  { %3912 = vmatprep.subr.bf16.mxu1 %v4993_v11  ;;  %v579_v8 = vld [vmem:[#allocation7 + $0xb78] sm:$0xff]  ;;  %v5038_v11 = vcombine.low %v566_v54, %v570_v55  ;;  %v5087_v55 = vcombine.high %v614_v45, %v618_v46 }
 0x23c   :  { %v5049_v13 = vcombine.high %v575_v7, %v579_v8  ;;  %v5048_v28 = vcombine.low %v575_v7, %v579_v8  ;;  %v630_v7 = vld [vmem:[#allocation7 + $0xd10] sm:$0xff] }
 0x23d   :  { %3749 = vmatpush1.bf16.msra.mxu0 %v4990_v16  ;;  %v586_v16 = vld [vmem:[#allocation7 + $0xbb0] sm:$0xff] }
 0x23e   :  { %3913 = vmatpush1.bf16.msra.mxu1 %v4992_v22  ;;  %3750 = vmatprep.subr.bf16.mxu0 %v4999_v24  ;;  %v583_v22 = vld [vmem:[#allocation7 + $0xb98] sm:$0xff]  ;;  %v5055_v27 = vcombine.high %v582_v14, %v586_v16  ;;  %v634_v8 = vld [vmem:[#allocation7 + $0xd30] sm:$0xff] }
 0x23f   :  { %3914 = vmatprep.subr.bf16.mxu1 %v5001_v17  ;;  %v587_v24 = vld [vmem:[#allocation7 + $0xbb8] sm:$0xff]  ;;  %v5046_v17 = vcombine.low %v574_v3, %v578_v4 }
 0x240   :  { %v5057_v29 = vcombine.high %v583_v22, %v587_v24  ;;  %v5056_v63 = vcombine.low %v583_v22, %v587_v24  ;;  %v642_v22 = vld [vmem:[#allocation7 + $0xd70] sm:$0xff]  ;;  %v639_v24 = vld [vmem:[#allocation7 + $0xd58] sm:$0xff] }
 0x241   :  { %3751 = vmatpush1.bf16.msra.mxu0 %v4998_v31  ;;  %v594_v31 = vld [vmem:[#allocation7 + $0xbf0] sm:$0xff] }
 0x242   :  { %3915 = vmatpush1.bf16.msra.mxu1 %v5000_v59  ;;  %3752 = vmatprep.subr.bf16.mxu0 %v5007_v60  ;;  %v591_v59 = vld [vmem:[#allocation7 + $0xbd8] sm:$0xff]  ;;  %v5063_v0 = vcombine.high %v590_v30, %v594_v31 }
 0x243   :  { %3916 = vmatprep.subr.bf16.mxu1 %v5009_v62  ;;  %v595_v60 = vld [vmem:[#allocation7 + $0xbf8] sm:$0xff]  ;;  %v5054_v62 = vcombine.low %v582_v14, %v586_v16  ;;  %v638_v16 = vld [vmem:[#allocation7 + $0xd50] sm:$0xff] }
 0x244   :  { %v5065_v2 = vcombine.high %v591_v59, %v595_v60  ;;  %v5064_v10 = vcombine.low %v591_v59, %v595_v60  ;;  %v650_v59 = vld [vmem:[#allocation7 + $0xdb0] sm:$0xff]  ;;  %v647_v60 = vld [vmem:[#allocation7 + $0xd98] sm:$0xff] }
 0x245   :  { %3753 = vmatpush1.bf16.msra.mxu0 %v5006_v34  ;;  %v602_v34 = vld [vmem:[#allocation7 + $0xc30] sm:$0xff] }
 0x246   :  { %3917 = vmatpush1.bf16.msra.mxu1 %v5008_v35  ;;  %3754 = vmatprep.subr.bf16.mxu0 %v5015_v36  ;;  %v599_v35 = vld [vmem:[#allocation7 + $0xc18] sm:$0xff]  ;;  %v5071_v38 = vcombine.high %v598_v32, %v602_v34 }
 0x247   :  { %3918 = vmatprep.subr.bf16.mxu1 %v5017_v9  ;;  %v603_v36 = vld [vmem:[#allocation7 + $0xc38] sm:$0xff]  ;;  %v5062_v9 = vcombine.low %v590_v30, %v594_v31  ;;  %v646_v31 = vld [vmem:[#allocation7 + $0xd90] sm:$0xff] }
 0x248   :  { %v5073_v48 = vcombine.high %v599_v35, %v603_v36  ;;  %v5072_v44 = vcombine.low %v599_v35, %v603_v36  ;;  %v654_v35 = vld [vmem:[#allocation7 + $0xdd0] sm:$0xff] }
 0x249   :  { %3755 = vmatpush1.bf16.msra.mxu0 %v5014_v41  ;;  %v610_v41 = vld [vmem:[#allocation7 + $0xc70] sm:$0xff] }
 0x24a   :  { %3919 = vmatpush1.bf16.msra.mxu1 %v5016_v5  ;;  %3756 = vmatprep.subr.bf16.mxu0 %v5023_v42  ;;  %v5070_v5 = vcombine.low %v598_v32, %v602_v34  ;;  %v607_v42 = vld [vmem:[#allocation7 + $0xc58] sm:$0xff]  ;;  %v5079_v52 = vcombine.high %v606_v39, %v610_v41  ;;  %v658_v36 = vld [vmem:[#allocation7 + $0xdf0] sm:$0xff] }
 0x24b   :  { %3920 = vmatprep.subr.bf16.mxu1 %v5025_v43  ;;  %v611_v43 = vld [vmem:[#allocation7 + $0xc78] sm:$0xff] }
 0x24c   :  { %v5080_v54 = vcombine.low %v607_v42, %v611_v43 }
 0x24d   :  { %3757 = vmatpush1.bf16.msra.mxu0 %v5022_v47  ;;  %v5081_v47 = vcombine.high %v607_v42, %v611_v43 }
 0x24e   :  { %3921 = vmatpush1.bf16.msra.mxu1 %v5024_v49  ;;  %3758 = vmatprep.subr.bf16.mxu0 %v5031_v53  ;;  %v615_v49 = vld [vmem:[#allocation7 + $0xc98] sm:$0xff] }
 0x24f   :  { %3922 = vmatprep.subr.bf16.mxu1 %v5033_v50  ;;  %v619_v53 = vld [vmem:[#allocation7 + $0xcb8] sm:$0xff]  ;;  %v5078_v50 = vcombine.low %v606_v39, %v610_v41 }
 0x250   :  { %v5089_v51 = vcombine.high %v615_v49, %v619_v53 }
 0x251   :  { %3759 = vmatpush1.bf16.msra.mxu0 %v5030_v57  ;;  %v626_v57 = vld [vmem:[#allocation7 + $0xcf0] sm:$0xff] }
 0x252   :  { %3923 = vmatpush1.bf16.msra.mxu1 %v5032_v58  ;;  %3760 = vmatprep.subr.bf16.mxu0 %v5039_v61  ;;  %v623_v58 = vld [vmem:[#allocation7 + $0xcd8] sm:$0xff]  ;;  %v5095_v3 = vcombine.high %v622_v56, %v626_v57 }
 0x253   :  { %3924 = vmatprep.subr.bf16.mxu1 %v5041_v1  ;;  %v627_v61 = vld [vmem:[#allocation7 + $0xcf8] sm:$0xff]  ;;  %v5086_v1 = vcombine.low %v614_v45, %v618_v46 }
 0x254   :  { %v5097_v4 = vcombine.high %v623_v58, %v627_v61 }
 0x255   :  { %3761 = vmatpush1.bf16.msra.mxu0 %v5038_v11  ;;  %v631_v11 = vld [vmem:[#allocation7 + $0xd18] sm:$0xff] }
 0x256   :  { %3925 = vmatpush1.bf16.msra.mxu1 %v5040_v6  ;;  %3762 = vmatprep.subr.bf16.mxu0 %v5047_v12  ;;  %v635_v6 = vld [vmem:[#allocation7 + $0xd38] sm:$0xff]  ;;  %v5096_v12 = vcombine.low %v623_v58, %v627_v61  ;;  %v674_v58 = vld [vmem:[#allocation7 + $0xe70] sm:$0xff] }
 0x257   :  { %3926 = vmatprep.subr.bf16.mxu1 %v5049_v13  ;;  %v5103_v13 = vcombine.high %v630_v7, %v634_v8  ;;  %v5105_v14 = vcombine.high %v631_v11, %v635_v6  ;;  %v671_v61 = vld [vmem:[#allocation7 + $0xe58] sm:$0xff] }
 0x259   :  { %3763 = vmatpush1.bf16.msra.mxu0 %v5046_v17  ;;  %v643_v17 = vld [vmem:[#allocation7 + $0xd78] sm:$0xff] }
 0x25a   :  { %3927 = vmatpush1.bf16.msra.mxu1 %v5048_v28  ;;  %3764 = vmatprep.subr.bf16.mxu0 %v5055_v27  ;;  %v5102_v28 = vcombine.low %v630_v7, %v634_v8  ;;  %v5104_v27 = vcombine.low %v631_v11, %v635_v6  ;;  %v5113_v30 = vcombine.high %v639_v24, %v643_v17  ;;  %v678_v8 = vld [vmem:[#allocation7 + $0xe90] sm:$0xff]  ;;  %v679_v6 = vld [vmem:[#allocation7 + $0xe98] sm:$0xff] }
 0x25b   :  { %3928 = vmatprep.subr.bf16.mxu1 %v5057_v29  ;;  %v5111_v29 = vcombine.high %v638_v16, %v642_v22  ;;  %v682_v11 = vld [vmem:[#allocation7 + $0xeb0] sm:$0xff] }
 0x25d   :  { %3765 = vmatpush1.bf16.msra.mxu0 %v5054_v62  ;;  %v651_v62 = vld [vmem:[#allocation7 + $0xdb8] sm:$0xff] }
 0x25e   :  { %3929 = vmatpush1.bf16.msra.mxu1 %v5056_v63  ;;  %3766 = vmatprep.subr.bf16.mxu0 %v5063_v0  ;;  %v5110_v63 = vcombine.low %v638_v16, %v642_v22  ;;  %v5112_v0 = vcombine.low %v639_v24, %v643_v17  ;;  %v5121_v34 = vcombine.high %v647_v60, %v651_v62  ;;  %v686_v22 = vld [vmem:[#allocation7 + $0xed0] sm:$0xff]  ;;  %v687_v17 = vld [vmem:[#allocation7 + $0xed8] sm:$0xff] }
 0x25f   :  { %3930 = vmatprep.subr.bf16.mxu1 %v5065_v2  ;;  %v5119_v2 = vcombine.high %v646_v31, %v650_v59  ;;  %v690_v24 = vld [vmem:[#allocation7 + $0xef0] sm:$0xff] }
 0x261   :  { %3767 = vmatpush1.bf16.msra.mxu0 %v5062_v9 }
 0x262   :  { %3931 = vmatpush1.bf16.msra.mxu1 %v5064_v10  ;;  %3777 = vmatprep.subr.bf16.mxu0 %v5071_v38  ;;  %v655_v38 = vld [vmem:[#allocation7 + $0xdd8] sm:$0xff] }
 0x263   :  { %3941 = vmatprep.subr.bf16.mxu1 %v5073_v48  ;;  %v659_v48 = vld [vmem:[#allocation7 + $0xdf8] sm:$0xff] }
 0x264   :  { %3769 = vmatmul.mubr.bf16.vlgmr.msra.gmra.mrb[4].mxu0 %v5801_v33  ;;  %v5129_v46 = vcombine.high %v655_v38, %v659_v48 }
 0x265   :  { %3933 = vmatmul.mubr.bf16.vlgmr.msra.gmra.mrb[4].mxu1 %v5801_v33  ;;  %3778 = vmatpush1.bf16.msra.mxu0 %v5070_v5  ;;  %v5088_v33 = vcombine.low %v615_v49, %v619_v53  ;;  %v5118_v5 = vcombine.low %v646_v31, %v650_v59  ;;  %v666_v49 = vld [vmem:[#allocation7 + $0xe30] sm:$0xff]  ;;  %v663_v53 = vld [vmem:[#allocation7 + $0xe18] sm:$0xff] }
 0x266   :  { %3809 = vmatprep.mubr.bf16.mxu0 %v5804_v37  ;;  %3942 = vmatpush1.bf16.msra.mxu1 %v5072_v44  ;;  %v5120_v44 = vcombine.low %v647_v60, %v651_v62  ;;  %v694_v59 = vld [vmem:[#allocation7 + $0xf10] sm:$0xff]  ;;  %v695_v62 = vld [vmem:[#allocation7 + $0xf18] sm:$0xff] }
 0x267   :  { %3973 = vmatprep.mubr.bf16.mxu1 %v5804_v37  ;;  %3779 = vmatprep.subr.bf16.mxu0 %v5079_v52  ;;  %v5094_v37 = vcombine.low %v622_v56, %v626_v57  ;;  %v5127_v52 = vcombine.high %v654_v35, %v658_v36  ;;  %v670_v57 = vld [vmem:[#allocation7 + $0xe50] sm:$0xff] }
 0x268   :  { %3943 = vmatprep.subr.bf16.mxu1 %v5081_v47  ;;  %v662_v47 = vld [vmem:[#allocation7 + $0xe10] sm:$0xff] }
 0x269   :  { %3780 = vmatpush1.bf16.msra.mxu0 %v5078_v50  ;;  %v667_v50 = vld [vmem:[#allocation7 + $0xe38] sm:$0xff]  ;;  %v698_v60 = vld [vmem:[#allocation7 + $0xf30] sm:$0xff] }
 0x26a   :  { %3944 = vmatpush1.bf16.msra.mxu1 %v5080_v54  ;;  %3781 = vmatprep.subr.bf16.mxu0 %v5087_v55  ;;  %v5126_v54 = vcombine.low %v654_v35, %v658_v36  ;;  %v5128_v55 = vcombine.low %v655_v38, %v659_v48  ;;  %v5137_v56 = vcombine.high %v663_v53, %v667_v50  ;;  %v702_v36 = vld [vmem:[#allocation7 + $0xf50] sm:$0xff]  ;;  %v703_v48 = vld [vmem:[#allocation7 + $0xf58] sm:$0xff] }
 0x26b   :  { %3945 = vmatprep.subr.bf16.mxu1 %v5089_v51  ;;  %v5135_v51 = vcombine.high %v662_v47, %v666_v49  ;;  %v706_v38 = vld [vmem:[#allocation7 + $0xf70] sm:$0xff] }
 0x26d   :  { %3782 = vmatpush1.bf16.msra.mxu0 %v5086_v1  ;;  %v675_v1 = vld [vmem:[#allocation7 + $0xe78] sm:$0xff] }
 0x26e   :  { %3946 = vmatpush1.bf16.msra.mxu1 %v5088_v33  ;;  %3783 = vmatprep.subr.bf16.mxu0 %v5095_v3  ;;  %v5134_v33 = vcombine.low %v662_v47, %v666_v49  ;;  %v5136_v3 = vcombine.low %v663_v53, %v667_v50  ;;  %v5145_v7 = vcombine.high %v671_v61, %v675_v1  ;;  %v715_v47 = vld [vmem:[#allocation7 + $0xfb8] sm:$0xff]  ;;  %v5836_v49 = vld [vmem:[#allocation8] sm:$0xff] }
 0x26f   :  { %3947 = vmatprep.subr.bf16.mxu1 %v5097_v4  ;;  %v5143_v4 = vcombine.high %v670_v57, %v674_v58  ;;  %v5174_v53 = vcombine.low %v702_v36, %v706_v38 }
 0x271   :  { %3784 = vmatpush1.bf16.msra.mxu0 %v5094_v37  ;;  %v683_v37 = vld [vmem:[#allocation7 + $0xeb8] sm:$0xff] }
 0x272   :  { %3948 = vmatpush1.bf16.msra.mxu1 %v5096_v12  ;;  %3785 = vmatprep.subr.bf16.mxu0 %v5103_v13  ;;  %v5142_v12 = vcombine.low %v670_v57, %v674_v58  ;;  %v5144_v13 = vcombine.low %v671_v61, %v675_v1  ;;  %v5153_v16 = vcombine.high %v679_v6, %v683_v37  ;;  %v719_v58 = vld [vmem:[#allocation7 + $0xfd8] sm:$0xff] }
 0x273   :  { %3949 = vmatprep.subr.bf16.mxu1 %v5105_v14  ;;  %v5151_v14 = vcombine.high %v678_v8, %v682_v11  ;;  %v733_v57 = vrot.slane %v5836_v49, %v5729_v18  ;;  %v723_v61 = vld [vmem:[#allocation7 + $0xff8] sm:$0xff]  ;;  %v741_v1 = vrot.slane %v5836_v49, %v5733_v20  ;;  %v5414_v20 = vld [vmem:[#allocation10 + $0xc0] sm:$0xff]  }
 0x274   :  { %v5192_v18 = vcombine.low %v719_v58, %v723_v61 }
 0x275   :  { %3786 = vmatpush1.bf16.msra.mxu0 %v5102_v28  ;;  %v691_v28 = vld [vmem:[#allocation7 + $0xef8] sm:$0xff] }
 0x276   :  { %3950 = vmatpush1.bf16.msra.mxu1 %v5104_v27  ;;  %3787 = vmatprep.subr.bf16.mxu0 %v5111_v29  ;;  %v5150_v27 = vcombine.low %v678_v8, %v682_v11  ;;  %v5152_v29 = vcombine.low %v679_v6, %v683_v37  ;;  %v5161_v31 = vcombine.high %v687_v17, %v691_v28  ;;  %v5413_v37 = vld [vmem:[#allocation10 + $0x40] sm:$0xff]  }
 0x277   :  { %v5828_v32 = vpop.f32.mrb[0].mxu0  ;;  %3951 = vmatprep.subr.bf16.mxu1 %v5113_v30  ;;  %v5159_v30 = vcombine.high %v686_v22, %v690_v24 }
 0x278   :  { %v5830_v9 = vpop.f32.mrb[0].mxu1  ;;  %v5832_v10 = vpop.f32.mrb[1].mxu0 }
 0x279   :  { %v5834_v39 = vpop.f32.mrb[1].mxu1  ;;  %v3487_v41 = vpop.f32.mrb[2].mxu0  ;;  %3788 = vmatpush1.bf16.msra.mxu0 %v5110_v63  ;;  %v699_v63 = vld [vmem:[#allocation7 + $0xf38] sm:$0xff]  ;;  %v5347_v8 = vadd.f32 %v5832_v10, %v733_v57  ;;  %v5448_v57 = vld [vmem:[#allocation10 + $0x180] sm:$0xff]  }
 0x27a   :  { %v3651_v42 = vpop.f32.mrb[2].mxu1  ;;  %3952 = vmatpush1.bf16.msra.mxu1 %v5112_v0  ;;  %v3488_v43 = vpop.f32.mrb[3].mxu0  ;;  %3789 = vmatprep.subr.bf16.mxu0 %v5119_v2  ;;  %v5158_v0 = vcombine.low %v686_v22, %v690_v24  ;;  %v5160_v2 = vcombine.low %v687_v17, %v691_v28  ;;  %v5169_v35 = vcombine.high %v695_v62, %v699_v63  ;;  %v707_v41 = vld [vmem:[#allocation7 + $0xf78] sm:$0xff]  ;;  %v5417_v22 = vld [vmem:[#allocation10 + $0x48] sm:$0xff]  }
 0x27b   :  { %v3652_v45 = vpop.f32.mrb[3].mxu1  ;;  %3953 = vmatprep.subr.bf16.mxu1 %v5121_v34  ;;  %v5167_v34 = vcombine.high %v694_v59, %v698_v60  ;;  %v5168_v42 = vcombine.low %v695_v62, %v699_v63  ;;  %v5175_v43 = vcombine.high %v702_v36, %v706_v38  ;;  %v5176_v50 = vcombine.low %v703_v48, %v707_v41  ;;  %v5419_v17 = vld [vmem:[#allocation10 + $0x8] sm:$0xff]   ;;  %v5428_v62 = vld [vmem:[#allocation10 + $0x98] sm:$0xff]   ;;  %v5429_v63 = vld [vmem:[#allocation10 + $0x60] sm:$0xff]  }
 0x27c   :  { %v714_v45 = vld [vmem:[#allocation7 + $0xfb0] sm:$0xff]  ;;  %v5349_v11 = vadd.f32 %v5834_v39, %v741_v1 }
 0x27d   :  { %3790 = vmatpush1.bf16.msra.mxu0 %v5118_v5  ;;  %v5166_v5 = vcombine.low %v694_v59, %v698_v60  ;;  %v5418_v39 = vld [vmem:[#allocation10 + $0xc8] sm:$0xff]   ;;  %v5425_v59 = vld [vmem:[#allocation10 + $0x58] sm:$0xff]  }
 0x27e   :  { %3954 = vmatpush1.bf16.msra.mxu1 %v5120_v44  ;;  %3791 = vmatprep.subr.bf16.mxu0 %v5127_v52  ;;  %v5177_v44 = vcombine.high %v703_v48, %v707_v41  ;;  %v710_v52 = vld [vmem:[#allocation7 + $0xf90] sm:$0xff]  ;;  %v5426_v60 = vld [vmem:[#allocation10 + $0xd8] sm:$0xff]   ;;  %v729_v48 = vrot.slane %v5836_v49, %v5731_v19 }
 0x27f   :  { %3955 = vmatprep.subr.bf16.mxu1 %v5129_v46  ;;  %v711_v46 = vld [vmem:[#allocation7 + $0xf98] sm:$0xff]  ;;  %v5420_v28 = vld [vmem:[#allocation10 + $0x88] sm:$0xff]   ;;  %v5442_v19 = vld [vmem:[#allocation10 + $0xf8] sm:$0xff]  }
 0x280   :  { %v5434_v36 = vld [vmem:[#allocation10 + $0xe8] sm:$0xff]  }
 0x281   :  { %3792 = vmatpush1.bf16.msra.mxu0 %v5126_v54  ;;  %v5183_v54 = vcombine.high %v710_v52, %v714_v45  ;;  %v5435_v38 = vld [vmem:[#allocation10 + $0x28] sm:$0xff]  }
 0x282   :  { %3956 = vmatpush1.bf16.msra.mxu1 %v5128_v55  ;;  %3793 = vmatprep.subr.bf16.mxu0 %v5135_v51  ;;  %v5185_v55 = vcombine.high %v711_v46, %v715_v47  ;;  %v718_v51 = vld [vmem:[#allocation7 + $0xfd0] sm:$0xff] }
 0x283   :  { %3957 = vmatprep.subr.bf16.mxu1 %v5137_v56  ;;  %v722_v56 = vld [vmem:[#allocation7 + $0xff0] sm:$0xff] }
 0x284   :  { %v5190_v6 = vcombine.low %v718_v51, %v722_v56  ;;  %v5436_v41 = vld [vmem:[#allocation10 + $0xa8] sm:$0xff]  }
 0x285   :  { %3794 = vmatpush1.bf16.msra.mxu0 %v5134_v33  ;;  %v5182_v33 = vcombine.low %v710_v52, %v714_v45  ;;  %v5346_v52 = vadd.f32 %v5828_v32, %v729_v48  ;;  %v5440_v45 = vld [vmem:[#allocation10 + $0xb0] sm:$0xff]   ;;  %v5447_v32 = vld [vmem:[#allocation10 + $0x100] sm:$0xff]   ;;  %v5451_v1 = vld [vmem:[#allocation10 + $0x108] sm:$0xff]  }
 0x286   :  { %3958 = vmatpush1.bf16.msra.mxu1 %v5136_v3  ;;  %3795 = vmatprep.subr.bf16.mxu0 %v5143_v4  ;;  %v5184_v3 = vcombine.low %v711_v46, %v715_v47  ;;  %v5191_v4 = vcombine.high %v718_v51, %v722_v56  ;;  %v5441_v46 = vld [vmem:[#allocation10 + $0x78] sm:$0xff]   ;;  %v5446_v51 = vld [vmem:[#allocation10 + $0x1c0] sm:$0xff]  }
 0x287   :  { %3959 = vmatprep.subr.bf16.mxu1 %v5145_v7  ;;  %v5193_v7 = vcombine.high %v719_v58, %v723_v61  ;;  %v5449_v58 = vld [vmem:[#allocation10 + $0x148] sm:$0xff]  }
 0x288   :  { %v5450_v61 = vld [vmem:[#allocation10 + $0x1c8] sm:$0xff]  }
 0x289   :  { %3796 = vmatpush1.bf16.msra.mxu0 %v5142_v12  ;;  %v3983_v12 = vmax.f32 %v5347_v8, 0.0  ;;  %v5456_v8 = vld [vmem:[#allocation10 + $0x190] sm:$0xff]  }
 0x28a   :  { %3960 = vmatpush1.bf16.msra.mxu1 %v5144_v13  ;;  %3797 = vmatprep.subr.bf16.mxu0 %v5151_v14  ;;  %v3985_v13 = vmax.f32 %v5349_v11, 0.0  ;;  %v5415_v14 = vld [vmem:[#allocation10] sm:$0xff]   ;;  %v5457_v11 = vld [vmem:[#allocation10 + $0x158] sm:$0xff]  }
 0x28b   :  { %3961 = vmatprep.subr.bf16.mxu1 %v5153_v16  ;;  %v5416_v16 = vld [vmem:[#allocation10 + $0x80] sm:$0xff]   ;;  %v3991_v10 = vpack.c.bf16 %v3983_v12, %v3983_v12 }
 0x28c   :  { %v3993_v24 = vpack.c.bf16 %v3985_v13, %v3985_v13  ;;  %v5462_v12 = vld [vmem:[#allocation10 + $0x1e0] sm:$0xff]  }
 0x28d   :  { %3798 = vmatpush1.bf16.msra.mxu0 %v5150_v27  ;;  %v5421_v27 = vld [vmem:[#allocation10 + $0x50] sm:$0xff]   ;;  %v5463_v13 = vld [vmem:[#allocation10 + $0x120] sm:$0xff]  }
 0x28e   :  { %3962 = vmatpush1.bf16.msra.mxu1 %v5152_v29  ;;  %3799 = vmatprep.subr.bf16.mxu0 %v5159_v30  ;;  %v5422_v29 = vld [vmem:[#allocation10 + $0xd0] sm:$0xff]  }
 0x28f   :  { %3963 = vmatprep.subr.bf16.mxu1 %v5161_v31  ;;  %v5423_v30 = vld [vmem:[#allocation10 + $0x10] sm:$0xff]  }
 0x290   :  { %v5424_v31 = vld [vmem:[#allocation10 + $0x90] sm:$0xff]  }
 0x291   :  { %3800 = vmatpush1.bf16.msra.mxu0 %v5158_v0  ;;  %v5430_v0 = vld [vmem:[#allocation10 + $0xe0] sm:$0xff]  }
 0x292   :  { %3964 = vmatpush1.bf16.msra.mxu1 %v5160_v2  ;;  %3801 = vmatprep.subr.bf16.mxu0 %v5167_v34  ;;  %v5431_v2 = vld [vmem:[#allocation10 + $0x20] sm:$0xff]  }
 0x293   :  { %3965 = vmatprep.subr.bf16.mxu1 %v5169_v35  ;;  %v5432_v34 = vld [vmem:[#allocation10 + $0xa0] sm:$0xff]   ;;  %v5433_v35 = vld [vmem:[#allocation10 + $0x68] sm:$0xff]  }
 0x295   :  { %3802 = vmatpush1.bf16.msra.mxu0 %v5166_v5  ;;  %v5437_v5 = vld [vmem:[#allocation10 + $0x70] sm:$0xff]  }
 0x296   :  { %3966 = vmatpush1.bf16.msra.mxu1 %v5168_v42  ;;  %3803 = vmatprep.subr.bf16.mxu0 %v5175_v43  ;;  %v737_v42 = vrot.slane %v5836_v49, %v5735_v21  ;;  %v5438_v43 = vld [vmem:[#allocation10 + $0xf0] sm:$0xff]   ;;  %v5444_v21 = vld [vmem:[#allocation10 + $0xb8] sm:$0xff]  }
 0x297   :  { %3967 = vmatprep.subr.bf16.mxu1 %v5177_v44  ;;  %v5439_v44 = vld [vmem:[#allocation10 + $0x30] sm:$0xff]  }
 0x298   :  { %v5348_v47 = vadd.f32 %v5830_v9, %v737_v42 }
 0x299   :  { %3804 = vmatpush1.bf16.msra.mxu0 %v5174_v53  ;;  %v5443_v53 = vld [vmem:[#allocation10 + $0x38] sm:$0xff]  }
 0x29a   :  { %3968 = vmatpush1.bf16.msra.mxu1 %v5176_v50  ;;  %3805 = vmatprep.subr.bf16.mxu0 %v5183_v54  ;;  %v3982_v50 = vmax.f32 %v5346_v52, 0.0  ;;  %v5445_v54 = vld [vmem:[#allocation10 + $0x140] sm:$0xff]  }
 0x29b   :  { %3969 = vmatprep.subr.bf16.mxu1 %v5185_v55  ;;  %v3984_v55 = vmax.f32 %v5348_v47, 0.0 }
 0x29c   :  { %v3990_v56 = vpack.c.bf16 %v3982_v50, %v3982_v50 }
 0x29d   :  { %3806 = vmatpush1.bf16.msra.mxu0 %v5182_v33  ;;  %v3992_v9 = vpack.c.bf16 %v3984_v55, %v3984_v55  ;;  %v5452_v33 = vld [vmem:[#allocation10 + $0x188] sm:$0xff]  }
 0x29e   :  { %3970 = vmatpush1.bf16.msra.mxu1 %v5184_v3  ;;  %3807 = vmatprep.subr.bf16.mxu0 %v5191_v4  ;;  %v5453_v3 = vld [vmem:[#allocation10 + $0x150] sm:$0xff]  }
 0x29f   :  { %3971 = vmatprep.subr.bf16.mxu1 %v5193_v7  ;;  %v5454_v4 = vld [vmem:[#allocation10 + $0x1d0] sm:$0xff]  }
 0x2a0   :  { %v5455_v7 = vld [vmem:[#allocation10 + $0x110] sm:$0xff]  }
 0x2a1   :  { %3808 = vmatpush1.bf16.msra.mxu0 %v5190_v6  ;;  %v5458_v6 = vld [vmem:[#allocation10 + $0x1d8] sm:$0xff]  }
 0x2a2   :  { %3972 = vmatpush1.bf16.msra.mxu1 %v5192_v18  ;;  %5258 = vmatprep.subr.bf16.mxu0 %v5413_v37  ;;  %v5459_v18 = vld [vmem:[#allocation10 + $0x118] sm:$0xff]  }
 0x2a3   :  { %5280 = vmatprep.subr.bf16.mxu1 %v5414_v20  ;;  %v5460_v37 = vld [vmem:[#allocation10 + $0x198] sm:$0xff]   ;;  %v5461_v20 = vld [vmem:[#allocation10 + $0x160] sm:$0xff]  }
 0x2a4   :  { %3810 = vmatmul.mubr.bf16.vlgmr.msra.gmra.mrb[4].mxu0 %v5810_v15 }
 0x2a5   :  { %3974 = vmatmul.mubr.bf16.vlgmr.msra.gmra.mrb[4].mxu1 %v5810_v15  ;;  %5259 = vmatpush3.bf16.msra.mxu0 %v5415_v14  ;;  %v5427_v15 = vld [vmem:[#allocation10 + $0x18] sm:$0xff]   ;;  %v5464_v14 = vld [vmem:[#allocation10 + $0x1a0] sm:$0xff]  }
 0x2a6   :  { %4542 = vmatprep.mubr.bf16.mxu0 %v3991_v10  ;;  %5281 = vmatpush3.bf16.msra.mxu1 %v5416_v16  ;;  %v5465_v16 = vld [vmem:[#allocation10 + $0x168] sm:$0xff]  }
 0x2a7   :  { %4582 = vmatprep.mubr.bf16.mxu1 %v3993_v24  ;;  %5260 = vmatprep.subr.bf16.mxu0 %v5417_v22  ;;  %v5466_v22 = vld [vmem:[#allocation10 + $0x1e8] sm:$0xff]   ;;  %v5469_v24 = vld [vmem:[#allocation10 + $0x170] sm:$0xff]  }
 0x2a8   :  { %5282 = vmatprep.subr.bf16.mxu1 %v5418_v39  ;;  %v5467_v10 = vld [vmem:[#allocation10 + $0x128] sm:$0xff]  }
 0x2a9   :  { %5261 = vmatpush3.bf16.msra.mxu0 %v5419_v17  ;;  %v5468_v39 = vld [vmem:[#allocation10 + $0x1a8] sm:$0xff]   ;;  %v5470_v17 = vld [vmem:[#allocation10 + $0x1f0] sm:$0xff]  }
 0x2aa   :  { %5283 = vmatpush3.bf16.msra.mxu1 %v5420_v28  ;;  %5262 = vmatprep.subr.bf16.mxu0 %v5421_v27  ;;  %v5471_v28 = vld [vmem:[#allocation10 + $0x130] sm:$0xff]  }
 0x2ab   :  { %5284 = vmatprep.subr.bf16.mxu1 %v5422_v29  ;;  %v5472_v27 = vld [vmem:[#allocation10 + $0x1b0] sm:$0xff]   ;;  %v5473_v29 = vld [vmem:[#allocation10 + $0x178] sm:$0xff]  }
 0x2ad   :  { %5263 = vmatpush3.bf16.msra.mxu0 %v5423_v30  ;;  %v5474_v30 = vld [vmem:[#allocation10 + $0x1f8] sm:$0xff]  }
 0x2ae   :  { %5285 = vmatpush3.bf16.msra.mxu1 %v5424_v31  ;;  %5264 = vmatprep.subr.bf16.mxu0 %v5425_v59  ;;  %v5475_v31 = vld [vmem:[#allocation10 + $0x138] sm:$0xff]  }
 0x2af   :  { %5286 = vmatprep.subr.bf16.mxu1 %v5426_v60  ;;  %v5476_v59 = vld [vmem:[#allocation10 + $0x1b8] sm:$0xff]   ;;  %v745_v60 = vrot.slane %v5836_v49, %v5739_v25 }
 0x2b1   :  { %5265 = vmatpush3.bf16.msra.mxu0 %v5427_v15  ;;  %v753_v15 = vrot.slane %v5836_v49, %v5755_v40 }
 0x2b2   :  { %5287 = vmatpush3.bf16.msra.mxu1 %v5428_v62  ;;  %5266 = vmatprep.subr.bf16.mxu0 %v5429_v63  ;;  %v749_v62 = vrot.slane %v5836_v49, %v5737_v23  ;;  %v757_v63 = vrot.slane %v5836_v49, %v5741_v26 }
 0x2b3   :  { %5288 = vmatprep.subr.bf16.mxu1 %v5430_v0 }
 0x2b5   :  { %5267 = vmatpush3.bf16.msra.mxu0 %v5431_v2 }
 0x2b6   :  { %5289 = vmatpush3.bf16.msra.mxu1 %v5432_v34  ;;  %5268 = vmatprep.subr.bf16.mxu0 %v5433_v35 }
 0x2b7   :  { %5290 = vmatprep.subr.bf16.mxu1 %v5434_v36 }
 0x2b9   :  { %5269 = vmatpush3.bf16.msra.mxu0 %v5435_v38 }
 0x2ba   :  { %5291 = vmatpush3.bf16.msra.mxu1 %v5436_v41  ;;  %5270 = vmatprep.subr.bf16.mxu0 %v5437_v5 }
 0x2bb   :  { %5292 = vmatprep.subr.bf16.mxu1 %v5438_v43 }
 0x2bd   :  { %5271 = vmatpush3.bf16.msra.mxu0 %v5439_v44 }
 0x2be   :  { %5293 = vmatpush3.bf16.msra.mxu1 %v5440_v45  ;;  %5272 = vmatprep.subr.bf16.mxu0 %v5441_v46 }
 0x2bf   :  { %5294 = vmatprep.subr.bf16.mxu1 %v5442_v19 }
 0x2c1   :  { %5273 = vmatpush3.bf16.msra.mxu0 %v5443_v53 }
 0x2c2   :  { %5295 = vmatpush3.bf16.msra.mxu1 %v5444_v21  ;;  %5302 = vmatprep.subr.bf16.mxu0 %v5445_v54 }
 0x2c3   :  { %5324 = vmatprep.subr.bf16.mxu1 %v5446_v51 }
 0x2c4   :  { %4543 = vmatmul.mubr.bf16.vlgmr.msra.gmra.mrb[8].mxu0 %v3990_v56 }
 0x2c5   :  { %4583 = vmatmul.mubr.bf16.vlgmr.msra.gmra.mrb[8].mxu1 %v3992_v9  ;;  %5303 = vmatpush3.bf16.msra.mxu0 %v5447_v32 }
 0x2c6   :  { %5325 = vmatpush3.bf16.msra.mxu1 %v5448_v57  ;;  %5304 = vmatprep.subr.bf16.mxu0 %v5449_v58 }
 0x2c7   :  { %5326 = vmatprep.subr.bf16.mxu1 %v5450_v61 }
 0x2c9   :  { %5305 = vmatpush3.bf16.msra.mxu0 %v5451_v1 }
 0x2ca   :  { %5327 = vmatpush3.bf16.msra.mxu1 %v5452_v33  ;;  %5306 = vmatprep.subr.bf16.mxu0 %v5453_v3 }
 0x2cb   :  { %5328 = vmatprep.subr.bf16.mxu1 %v5454_v4 }
 0x2cd   :  { %5307 = vmatpush3.bf16.msra.mxu0 %v5455_v7 }
 0x2ce   :  { %5329 = vmatpush3.bf16.msra.mxu1 %v5456_v8  ;;  %5308 = vmatprep.subr.bf16.mxu0 %v5457_v11 }
 0x2cf   :  { %5330 = vmatprep.subr.bf16.mxu1 %v5458_v6 }
 0x2d1   :  { %5309 = vmatpush3.bf16.msra.mxu0 %v5459_v18  ;;  %v4671_v18 = vstv %s5872_s6 }
 0x2d2   :  { %5331 = vmatpush3.bf16.msra.mxu1 %v5460_v37  ;;  %5310 = vmatprep.subr.bf16.mxu0 %v5461_v20 }
 0x2d3   :  { %5332 = vmatprep.subr.bf16.mxu1 %v5462_v12 }
 0x2d5   :  { %5311 = vmatpush3.bf16.msra.mxu0 %v5463_v13 }
 0x2d6   :  { %5333 = vmatpush3.bf16.msra.mxu1 %v5464_v14  ;;  %5312 = vmatprep.subr.bf16.mxu0 %v5465_v16 }
 0x2d7   :  { %5334 = vmatprep.subr.bf16.mxu1 %v5466_v22 }
 0x2d9   :  { %5313 = vmatpush3.bf16.msra.mxu0 %v5467_v10 }
 0x2da   :  { %5335 = vmatpush3.bf16.msra.mxu1 %v5468_v39  ;;  %5314 = vmatprep.subr.bf16.mxu0 %v5469_v24 }
 0x2db   :  { %5336 = vmatprep.subr.bf16.mxu1 %v5470_v17 }
 0x2dd   :  { %5315 = vmatpush3.bf16.msra.mxu0 %v5471_v28 }
 0x2de   :  { %5337 = vmatpush3.bf16.msra.mxu1 %v5472_v27  ;;  %5316 = vmatprep.subr.bf16.mxu0 %v5473_v29 }
 0x2df   :  { %5338 = vmatprep.subr.bf16.mxu1 %v5474_v30 }
 0x2e1   :  { %5317 = vmatpush3.bf16.msra.mxu0 %v5475_v31 }
 0x2e2   :  { %5339 = vmatpush3.bf16.msra.mxu1 %v5476_v59 }
 0x377   :  { %v3811_v0 = vpop.f32.mrb[4].mxu0 }
 0x378   :  { %v5350_v2 = vadd.f32 %v3811_v0, %v745_v60  ;;  %v3975_v34 = vpop.f32.mrb[4].mxu1  ;;  %v3813_v35 = vpop.f32.mrb[5].mxu0 }
 0x379   :  { %v5352_v36 = vadd.f32 %v3975_v34, %v753_v15  ;;  %v5351_v38 = vadd.f32 %v3813_v35, %v749_v62  ;;  %v3977_v48 = vpop.f32.mrb[5].mxu1  ;;  %v3815_v41 = vpop.f32.mrb[6].mxu0 }
 0x37a   :  { %v3986_v5 = vmax.f32 %v5350_v2, 0.0  ;;  %v5353_v42 = vadd.f32 %v3977_v48, %v757_v63  ;;  %v3979_v25 = vpop.f32.mrb[6].mxu1  ;;  %v3816_v43 = vpop.f32.mrb[7].mxu0 }
 0x37b   :  { %v3988_v44 = vmax.f32 %v5352_v36, 0.0  ;;  %v3987_v40 = vmax.f32 %v5351_v38, 0.0  ;;  %v3980_v52 = vpop.f32.mrb[7].mxu1 }
 0x37c   :  { %v3989_v45 = vmax.f32 %v5353_v42, 0.0  ;;  %v3994_v46 = vpack.c.bf16 %v3986_v5, %v3986_v5 }
 0x37d   :  { %v3995_v23 = vpack.c.bf16 %v3987_v40, %v3987_v40  ;;  %v3996_v26 = vpack.c.bf16 %v3988_v44, %v3988_v44 }
 0x37e   :  { %v3997_v47 = vpack.c.bf16 %v3989_v45, %v3989_v45 }
 0x37f   :  { %4622 = vmatprep.mubr.bf16.mxu0 %v3995_v23 }
 0x380   :  { %4662 = vmatprep.mubr.bf16.mxu1 %v3997_v47  ;;  %4623 = vmatmul.mubr.bf16.vlgmr.msra.gmra.mrb[12].mxu0 %v3994_v46 }
 0x381   :  { %4663 = vmatmul.mubr.bf16.vlgmr.msra.gmra.mrb[12].mxu1 %v3996_v26 }
 0x397   :  { %v5274_v49 = vpop.f32.mrb[8].mxu0 }
 0x398   :  { %v5296_v19 = vpop.f32.mrb[8].mxu1  ;;  %v5275_v53 = vpop.f32.mrb[9].mxu0 }
 0x399   :  { %v5276_v50 = vadd.f32 %v5275_v53, %v5274_v49  ;;  %v5297_v21 = vpop.f32.mrb[9].mxu1  ;;  %v5277_v54 = vpop.f32.mrb[10].mxu0 }
 0x39a   :  { %v5298_v55 = vadd.f32 %v5297_v21, %v5296_v19  ;;  %v5299_v51 = vpop.f32.mrb[10].mxu1  ;;  %v5278_v32 = vpop.f32.mrb[11].mxu0 }
 0x39b   :  { %v5300_v56 = vpop.f32.mrb[11].mxu1 }
 0x39c   :  { %v4585_v57 = vadd.f32 %v5298_v55, %v5276_v50 }
 0x453   :  { %v5318_v58 = vpop.f32.mrb[12].mxu0 }
 0x454   :  { %v5340_v9 = vpop.f32.mrb[12].mxu1  ;;  %v5319_v61 = vpop.f32.mrb[13].mxu0 }
 0x455   :  { %v5320_v1 = vadd.f32 %v5319_v61, %v5318_v58  ;;  %v5341_v33 = vpop.f32.mrb[13].mxu1  ;;  %v5321_v3 = vpop.f32.mrb[14].mxu0 }
 0x456   :  { %v5342_v4 = vadd.f32 %v5341_v33, %v5340_v9  ;;  %v5343_v7 = vpop.f32.mrb[14].mxu1  ;;  %v5322_v8 = vpop.f32.mrb[15].mxu0 }
 0x457   :  { %v4625_v11 = vadd.f32 %v5320_v1, %v4585_v57  ;;  %v5344_v6 = vpop.f32.mrb[15].mxu1 }
 0x459   :  { %v4665_v37 = vadd.f32 %v5342_v4, %v4625_v11 }
 0x45b   :  { %v4672_v20 = vadd.f32 %v4671_v18, %v4665_v37 }
 0x45d   :  { %4674 = vst.msk [vmem:[%s5873_s7] sm:$0xff] %vm4673_vm0, %v4672_v20 }
 0x45e   :  { %4679 = vsyncpa [#allocation4], 1 }
 0x45f   :  { %4680 = vsyncpa [#allocation6], 1 }
 0x460   :  { %4681 = vsyncpa [#allocation9], 1 }

</bundles_post_ra>
